<compile_context>
chip_gen: v7x
topology: tpu7x:2x2x1
jax: 0.10.0
libtpu: 0.0.40
codegen_flags: <defaults>
</compile_context>

<pallas_src>
import jax
import jax.numpy as jnp
from jax.experimental import pallas as pl
from jax.experimental.pallas import tpu as pltpu

EPS = 1e-5  # nn.BatchNorm2d default eps


# ---------------------------------------------------------------------------
# Fused ResBlock kernel
# ---------------------------------------------------------------------------
def _resblock_kernel(x_ref, w1_ref, g1_ref, b1_ref, w2_ref, g2_ref, b2_ref,
                     out_ref, pad_ref):
    # Static shapes recovered from the padded scratch: (N, H+2, W+2, C).
    n, hp2, wp2, c = pad_ref.shape
    h, w = hp2 - 2, wp2 - 2
    m = n * h * w

    x = x_ref[...]                                        # (N, H, W, C) f32

    # ---- zero ONLY the 1-pixel border of the (reused) pad scratch ----------
    zrow = jnp.zeros((n, 1, wp2, c), pad_ref.dtype)       # top / bottom rows
    zcol = jnp.zeros((n, h, 1, c), pad_ref.dtype)         # left / right cols
    pad_ref[:, 0:1, :, :] = zrow
    pad_ref[:, h + 1:h + 2, :, :] = zrow
    pad_ref[:, 1:h + 1, 0:1, :] = zcol
    pad_ref[:, 1:h + 1, w + 1:w + 2, :] = zcol

    def conv3x3(w_ref):
        # im2col held in vregs: the 9 shifted taps concatenated along channels
        # -> (M, 9C), cast to bf16 once, ONE full-depth MXU matmul against the
        # (9C, C) weight, f32 accumulation.
        taps = [pad_ref[:, di:di + h, dj:dj + w, :].reshape(m, c)
                for di in range(3) for dj in range(3)]
        lhs = jnp.concatenate(taps, axis=-1).astype(jnp.bfloat16)   # (M, 9C)
        return jnp.dot(lhs, w_ref[...], preferred_element_type=jnp.float32)

    def batchnorm(acc, g_ref, b_ref):
        # Training-mode BatchNorm2d, one pass: E[x] and E[x^2] together,
        # biased variance = E[x^2] - mean^2 (f32, PyTorch forward semantics).
        mean = jnp.mean(acc, axis=0, keepdims=True)
        ex2 = jnp.mean(acc * acc, axis=0, keepdims=True)
        var = ex2 - mean * mean
        return (acc - mean) * (jax.lax.rsqrt(var + EPS) * g_ref[...]) + b_ref[...]

    # conv1 -> bn1 -> relu  (interior of the pad scratch = x)
    pad_ref[:, 1:h + 1, 1:w + 1, :] = x
    y1 = jnp.maximum(batchnorm(conv3x3(w1_ref), g1_ref, b1_ref), 0.0)

    # conv2 -> bn2  (reuse the SAME pad scratch: borders are already zero)
    pad_ref[:, 1:h + 1, 1:w + 1, :] = y1.reshape(n, h, w, c)
    y2 = batchnorm(conv3x3(w2_ref), g2_ref, b2_ref)

    # residual add (f32) + final relu
    out_ref[...] = jnp.maximum(y2.reshape(n, h, w, c) + x, 0.0)


# ---------------------------------------------------------------------------
# Wrapper (public API is NCHW, like the PyTorch module)
# ---------------------------------------------------------------------------
def resblock_forward(x_nchw, params):
    n, c, h, w = x_nchw.shape
    # NCHW -> NHWC once per block; in a multi-block tower keep NHWC throughout
    # and convert only at the network boundary (see TODO above).
    x = jnp.transpose(x_nchw, (0, 2, 3, 1)).astype(jnp.float32)

    def prep_w(w_oihw):
        # (Cout, Cin, 3, 3) -> (KH, KW, Cin, Cout) -> (9*Cin, Cout): im2col
        # weight layout matching the kernel's tap order (di, dj, cin), bf16.
        return (jnp.transpose(w_oihw, (2, 3, 1, 0))
                .reshape(9 * c, c).astype(jnp.bfloat16))

    w1 = prep_w(params["conv1_w"])
    w2 = prep_w(params["conv2_w"])
    g1 = params["bn1_g"].reshape(1, c).astype(jnp.float32)
    b1 = params["bn1_b"].reshape(1, c).astype(jnp.float32)
    g2 = params["bn2_g"].reshape(1, c).astype(jnp.float32)
    b2 = params["bn2_b"].reshape(1, c).astype(jnp.float32)

    m = n * h * w
    flops = 2 * (2 * m * (9 * c) * c)                     # two full-depth matmuls
    bytes_accessed = 2 * m * c * 4 + (w1.size + w2.size) * 2 + 4 * c * 4

    vmem = pl.BlockSpec(memory_space=pltpu.MemorySpace.VMEM)
    out_nhwc = pl.pallas_call(
        _resblock_kernel,
        out_shape=jax.ShapeDtypeStruct((n, h, w, c), jnp.float32),
        in_specs=[vmem] * 7,
        out_specs=vmem,
        scratch_shapes=[pltpu.VMEM((n, h + 2, w + 2, c), jnp.float32)],
        cost_estimate=pl.CostEstimate(flops=flops,
                                      transcendentals=2 * c,
                                      bytes_accessed=bytes_accessed),
    )(x, w1, g1, b1, w2, g2, b2)

    return jnp.transpose(out_nhwc, (0, 3, 1, 2))          # NHWC -> NCHW


# ---------------------------------------------------------------------------
# Pure-JAX reference (f32) for a correctness sanity check
# ---------------------------------------------------------------------------
def resblock_reference(x_nchw, params):
    x = jnp.transpose(x_nchw, (0, 2, 3, 1)).astype(jnp.float32)

    def conv(a, w_oihw):
        w_hwio = jnp.transpose(w_oihw, (2, 3, 1, 0)).astype(jnp.float32)
        return jax.lax.conv_general_dilated(
            a, w_hwio, window_strides=(1, 1), padding=((1, 1), (1, 1)),
            dimension_numbers=("NHWC", "HWIO", "NHWC"))

    def bn(a, g, b):
        mean = jnp.mean(a, axis=(0, 1, 2), keepdims=True)
        var = jnp.mean((a - mean) ** 2, axis=(0, 1, 2), keepdims=True)
        return ((a - mean) * jax.lax.rsqrt(var + EPS)
                * g.reshape(1, 1, 1, -1) + b.reshape(1, 1, 1, -1))

    y = jax.nn.relu(bn(conv(x, params["conv1_w"]), params["bn1_g"], params["bn1_b"]))
    y = bn(conv(y, params["conv2_w"]), params["bn2_g"], params["bn2_b"]) + x
    y = jax.nn.relu(y)
    return jnp.transpose(y, (0, 3, 1, 2))


# ---------------------------------------------------------------------------
# Parameter init (deterministic; shapes per the PyTorch module __init__)
# ---------------------------------------------------------------------------
def init_params(key, num_hidden):
    k1, k2 = jax.random.split(key)
    fan_in = num_hidden * 9
    scale = (2.0 / fan_in) ** 0.5
    return {
        # Conv2d weights kept in PyTorch OIHW layout; re-laid-out in the wrapper.
        "conv1_w": jax.random.normal(k1, (num_hidden, num_hidden, 3, 3), jnp.float32) * scale,
        "conv2_w": jax.random.normal(k2, (num_hidden, num_hidden, 3, 3), jnp.float32) * scale,
        # BatchNorm2d defaults: weight=1, bias=0 (training-mode batch stats).
        "bn1_g": jnp.ones((num_hidden,), jnp.float32),
        "bn1_b": jnp.zeros((num_hidden,), jnp.float32),
        "bn2_g": jnp.ones((num_hidden,), jnp.float32),
        "bn2_b": jnp.zeros((num_hidden,), jnp.float32),
    }


if __name__ == "__main__":
    key = jax.random.PRNGKey(0)
    pkey, xkey = jax.random.split(key)

    num_hidden = 32
    params = init_params(pkey, num_hidden)

    # (batch=2, channels=num_hidden=32, 8x8 board), NCHW like the PyTorch module.
    x = jax.random.normal(xkey, (2, num_hidden, 8, 8), jnp.float32)

    y = jax.jit(resblock_forward)(x, params)
    jax.block_until_ready(y)

    assert y.shape == x.shape, y.shape
    assert bool(jnp.all(jnp.isfinite(y)))
    assert bool(jnp.all(y >= 0.0))          # final ReLU

    # Compare against the f32 reference (bf16 MXU operands -> loose tolerance).
    y_ref = resblock_reference(x, params)
    max_err = float(jnp.max(jnp.abs(y - y_ref)))
    assert max_err < 0.2, f"max abs error vs reference: {max_err}"

    print("KERNEL_OK")
</pallas_src>

<mosaic_0001>
module attributes {stable_mosaic.version = 11 : i64} {
  func.func @_resblock_kernel(%arg0: memref<2x8x8x32xf32, #tpu.memory_space<vmem>>, %arg1: memref<288x32xbf16, #tpu.memory_space<vmem>>, %arg2: memref<1x32xf32, #tpu.memory_space<vmem>>, %arg3: memref<1x32xf32, #tpu.memory_space<vmem>>, %arg4: memref<288x32xbf16, #tpu.memory_space<vmem>>, %arg5: memref<1x32xf32, #tpu.memory_space<vmem>>, %arg6: memref<1x32xf32, #tpu.memory_space<vmem>>, %arg7: memref<2x8x8x32xf32, #tpu.memory_space<vmem>>, %arg8: memref<2x10x10x32xf32, #tpu.memory_space<vmem>>) attributes {dimension_semantics = [], scalar_prefetch = 0 : i64, scratch_operands = 1 : i64, tpu.core_type = #tpu.core_type<tc>} {
    %c0 = arith.constant 0 : index
    %c0_0 = arith.constant 0 : index
    %c0_1 = arith.constant 0 : index
    %c0_2 = arith.constant 0 : index
    %0 = vector.load %arg0[%c0, %c0_0, %c0_1, %c0_2] : memref<2x8x8x32xf32, #tpu.memory_space<vmem>>, vector<2x8x8x32xf32>
    %cst = arith.constant 0.000000e+00 : f32
    %1 = vector.broadcast %cst : f32 to vector<2x1x10x32xf32>
    %cst_3 = arith.constant 0.000000e+00 : f32
    %2 = vector.broadcast %cst_3 : f32 to vector<2x8x1x32xf32>
    %c0_4 = arith.constant 0 : index
    %c0_5 = arith.constant 0 : index
    %c0_6 = arith.constant 0 : index
    %c0_7 = arith.constant 0 : index
    %3 = vector.load %arg8[%c0_4, %c0_5, %c0_6, %c0_7] : memref<2x10x10x32xf32, #tpu.memory_space<vmem>>, vector<2x1x10x32xf32>
    tpu.vector_store %arg8[%c0_4, %c0_5, %c0_6, %c0_7], %1 {strides = array<i32>} : memref<2x10x10x32xf32, #tpu.memory_space<vmem>>, vector<2x1x10x32xf32>,
    %c0_8 = arith.constant 0 : index
    %c9 = arith.constant 9 : index
    %c0_9 = arith.constant 0 : index
    %c0_10 = arith.constant 0 : index
    %4 = vector.load %arg8[%c0_8, %c9, %c0_9, %c0_10] : memref<2x10x10x32xf32, #tpu.memory_space<vmem>>, vector<2x1x10x32xf32>
    tpu.vector_store %arg8[%c0_8, %c9, %c0_9, %c0_10], %1 {strides = array<i32>} : memref<2x10x10x32xf32, #tpu.memory_space<vmem>>, vector<2x1x10x32xf32>,
    %c0_11 = arith.constant 0 : index
    %c1 = arith.constant 1 : index
    %c0_12 = arith.constant 0 : index
    %c0_13 = arith.constant 0 : index
    %5 = vector.load %arg8[%c0_11, %c1, %c0_12, %c0_13] : memref<2x10x10x32xf32, #tpu.memory_space<vmem>>, vector<2x8x1x32xf32>
    tpu.vector_store %arg8[%c0_11, %c1, %c0_12, %c0_13], %2 {strides = array<i32>} : memref<2x10x10x32xf32, #tpu.memory_space<vmem>>, vector<2x8x1x32xf32>,
    %c0_14 = arith.constant 0 : index
    %c1_15 = arith.constant 1 : index
    %c9_16 = arith.constant 9 : index
    %c0_17 = arith.constant 0 : index
    %6 = vector.load %arg8[%c0_14, %c1_15, %c9_16, %c0_17] : memref<2x10x10x32xf32, #tpu.memory_space<vmem>>, vector<2x8x1x32xf32>
    tpu.vector_store %arg8[%c0_14, %c1_15, %c9_16, %c0_17], %2 {strides = array<i32>} : memref<2x10x10x32xf32, #tpu.memory_space<vmem>>, vector<2x8x1x32xf32>,
    %c0_18 = arith.constant 0 : index
    %c1_19 = arith.constant 1 : index
    %c1_20 = arith.constant 1 : index
    %c0_21 = arith.constant 0 : index
    %7 = vector.load %arg8[%c0_18, %c1_19, %c1_20, %c0_21] : memref<2x10x10x32xf32, #tpu.memory_space<vmem>>, vector<2x8x8x32xf32>
    tpu.vector_store %arg8[%c0_18, %c1_19, %c1_20, %c0_21], %0 {strides = array<i32>} : memref<2x10x10x32xf32, #tpu.memory_space<vmem>>, vector<2x8x8x32xf32>,
    %c0_22 = arith.constant 0 : index
    %c0_23 = arith.constant 0 : index
    %c0_24 = arith.constant 0 : index
    %c0_25 = arith.constant 0 : index
    %8 = vector.load %arg8[%c0_22, %c0_23, %c0_24, %c0_25] : memref<2x10x10x32xf32, #tpu.memory_space<vmem>>, vector<2x8x8x32xf32>
    %9 = vector.shape_cast %8 : vector<2x8x8x32xf32> to vector<128x32xf32>
    %c0_26 = arith.constant 0 : index
    %c0_27 = arith.constant 0 : index
    %c1_28 = arith.constant 1 : index
    %c0_29 = arith.constant 0 : index
    %10 = vector.load %arg8[%c0_26, %c0_27, %c1_28, %c0_29] : memref<2x10x10x32xf32, #tpu.memory_space<vmem>>, vector<2x8x8x32xf32>
    %11 = vector.shape_cast %10 : vector<2x8x8x32xf32> to vector<128x32xf32>
    %c0_30 = arith.constant 0 : index
    %c0_31 = arith.constant 0 : index
    %c2 = arith.constant 2 : index
    %c0_32 = arith.constant 0 : index
    %12 = vector.load %arg8[%c0_30, %c0_31, %c2, %c0_32] : memref<2x10x10x32xf32, #tpu.memory_space<vmem>>, vector<2x8x8x32xf32>
    %13 = vector.shape_cast %12 : vector<2x8x8x32xf32> to vector<128x32xf32>
    %c0_33 = arith.constant 0 : index
    %c1_34 = arith.constant 1 : index
    %c0_35 = arith.constant 0 : index
    %c0_36 = arith.constant 0 : index
    %14 = vector.load %arg8[%c0_33, %c1_34, %c0_35, %c0_36] : memref<2x10x10x32xf32, #tpu.memory_space<vmem>>, vector<2x8x8x32xf32>
    %15 = vector.shape_cast %14 : vector<2x8x8x32xf32> to vector<128x32xf32>
    %c0_37 = arith.constant 0 : index
    %c1_38 = arith.constant 1 : index
    %c1_39 = arith.constant 1 : index
    %c0_40 = arith.constant 0 : index
    %16 = vector.load %arg8[%c0_37, %c1_38, %c1_39, %c0_40] : memref<2x10x10x32xf32, #tpu.memory_space<vmem>>, vector<2x8x8x32xf32>
    %17 = vector.shape_cast %16 : vector<2x8x8x32xf32> to vector<128x32xf32>
    %c0_41 = arith.constant 0 : index
    %c1_42 = arith.constant 1 : index
    %c2_43 = arith.constant 2 : index
    %c0_44 = arith.constant 0 : index
    %18 = vector.load %arg8[%c0_41, %c1_42, %c2_43, %c0_44] : memref<2x10x10x32xf32, #tpu.memory_space<vmem>>, vector<2x8x8x32xf32>
    %19 = vector.shape_cast %18 : vector<2x8x8x32xf32> to vector<128x32xf32>
    %c0_45 = arith.constant 0 : index
    %c2_46 = arith.constant 2 : index
    %c0_47 = arith.constant 0 : index
    %c0_48 = arith.constant 0 : index
    %20 = vector.load %arg8[%c0_45, %c2_46, %c0_47, %c0_48] : memref<2x10x10x32xf32, #tpu.memory_space<vmem>>, vector<2x8x8x32xf32>
    %21 = vector.shape_cast %20 : vector<2x8x8x32xf32> to vector<128x32xf32>
    %c0_49 = arith.constant 0 : index
    %c2_50 = arith.constant 2 : index
    %c1_51 = arith.constant 1 : index
    %c0_52 = arith.constant 0 : index
    %22 = vector.load %arg8[%c0_49, %c2_50, %c1_51, %c0_52] : memref<2x10x10x32xf32, #tpu.memory_space<vmem>>, vector<2x8x8x32xf32>
    %23 = vector.shape_cast %22 : vector<2x8x8x32xf32> to vector<128x32xf32>
    %c0_53 = arith.constant 0 : index
    %c2_54 = arith.constant 2 : index
    %c2_55 = arith.constant 2 : index
    %c0_56 = arith.constant 0 : index
    %24 = vector.load %arg8[%c0_53, %c2_54, %c2_55, %c0_56] : memref<2x10x10x32xf32, #tpu.memory_space<vmem>>, vector<2x8x8x32xf32>
    %25 = vector.shape_cast %24 : vector<2x8x8x32xf32> to vector<128x32xf32>
    %26 = tpu.concatenate %9, %11, %13, %15, %17, %19, %21, %23, %25 in 1 : vector<128x32xf32>, vector<128x32xf32>, vector<128x32xf32>, vector<128x32xf32>, vector<128x32xf32>, vector<128x32xf32>, vector<128x32xf32>, vector<128x32xf32>, vector<128x32xf32> -> vector<128x288xf32>
    %27 = arith.truncf %26 : vector<128x288xf32> to vector<128x288xbf16>
    %c0_57 = arith.constant 0 : index
    %c0_58 = arith.constant 0 : index
    %28 = vector.load %arg1[%c0_57, %c0_58] : memref<288x32xbf16, #tpu.memory_space<vmem>>, vector<288x32xbf16>
    %cst_59 = arith.constant dense<0.000000e+00> : vector<128x32xf32>
    %29 = tpu.matmul %27, %28, %cst_59 {dimension_numbers = #tpu.dot_dimension_numbers<[1], [0], [0], [1], [0, 0, 1, 1], [], []>} : vector<128x288xbf16>, vector<288x32xbf16>, vector<128x32xf32> -> vector<128x32xf32>
    %cst_60 = arith.constant dense<0.000000e+00> : vector<32xf32>
    %30 = vector.multi_reduction <add>, %29, %cst_60 [0] : vector<128x32xf32> to vector<32xf32>
    %31 = vector.shape_cast %30 : vector<32xf32> to vector<1x32xf32>
    %cst_61 = arith.constant 1.280000e+02 : f32
    %32 = vector.broadcast %cst_61 : f32 to vector<1x32xf32>
    %33 = arith.divf %31, %32 : vector<1x32xf32>
    %34 = arith.mulf %29, %29 : vector<128x32xf32>
    %cst_62 = arith.constant dense<0.000000e+00> : vector<32xf32>
    %35 = vector.multi_reduction <add>, %34, %cst_62 [0] : vector<128x32xf32> to vector<32xf32>
    %36 = vector.shape_cast %35 : vector<32xf32> to vector<1x32xf32>
    %cst_63 = arith.constant 1.280000e+02 : f32
    %37 = vector.broadcast %cst_63 : f32 to vector<1x32xf32>
    %38 = arith.divf %36, %37 : vector<1x32xf32>
    %39 = arith.mulf %33, %33 : vector<1x32xf32>
    %40 = arith.subf %38, %39 : vector<1x32xf32>
    %41 = vector.broadcast %33 : vector<1x32xf32> to vector<128x32xf32>
    %42 = arith.subf %29, %41 : vector<128x32xf32>
    %cst_64 = arith.constant 9.99999974E-6 : f32
    %43 = vector.broadcast %cst_64 : f32 to vector<1x32xf32>
    %44 = arith.addf %40, %43 : vector<1x32xf32>
    %45 = math.rsqrt %44 : vector<1x32xf32>
    %c0_65 = arith.constant 0 : index
    %c0_66 = arith.constant 0 : index
    %46 = vector.load %arg2[%c0_65, %c0_66] : memref<1x32xf32, #tpu.memory_space<vmem>>, vector<1x32xf32>
    %47 = arith.mulf %45, %46 : vector<1x32xf32>
    %48 = vector.broadcast %47 : vector<1x32xf32> to vector<128x32xf32>
    %49 = arith.mulf %42, %48 : vector<128x32xf32>
    %c0_67 = arith.constant 0 : index
    %c0_68 = arith.constant 0 : index
    %50 = vector.load %arg3[%c0_67, %c0_68] : memref<1x32xf32, #tpu.memory_space<vmem>>, vector<1x32xf32>
    %51 = vector.broadcast %50 : vector<1x32xf32> to vector<128x32xf32>
    %52 = arith.addf %49, %51 : vector<128x32xf32>
    %cst_69 = arith.constant 0.000000e+00 : f32
    %53 = vector.broadcast %cst_69 : f32 to vector<128x32xf32>
    %54 = arith.maximumf %52, %53 : vector<128x32xf32>
    %55 = vector.shape_cast %54 : vector<128x32xf32> to vector<2x8x8x32xf32>
    %c0_70 = arith.constant 0 : index
    %c1_71 = arith.constant 1 : index
    %c1_72 = arith.constant 1 : index
    %c0_73 = arith.constant 0 : index
    %56 = vector.load %arg8[%c0_70, %c1_71, %c1_72, %c0_73] : memref<2x10x10x32xf32, #tpu.memory_space<vmem>>, vector<2x8x8x32xf32>
    tpu.vector_store %arg8[%c0_70, %c1_71, %c1_72, %c0_73], %55 {strides = array<i32>} : memref<2x10x10x32xf32, #tpu.memory_space<vmem>>, vector<2x8x8x32xf32>,
    %c0_74 = arith.constant 0 : index
    %c0_75 = arith.constant 0 : index
    %c0_76 = arith.constant 0 : index
    %c0_77 = arith.constant 0 : index
    %57 = vector.load %arg8[%c0_74, %c0_75, %c0_76, %c0_77] : memref<2x10x10x32xf32, #tpu.memory_space<vmem>>, vector<2x8x8x32xf32>
    %58 = vector.shape_cast %57 : vector<2x8x8x32xf32> to vector<128x32xf32>
    %c0_78 = arith.constant 0 : index
    %c0_79 = arith.constant 0 : index
    %c1_80 = arith.constant 1 : index
    %c0_81 = arith.constant 0 : index
    %59 = vector.load %arg8[%c0_78, %c0_79, %c1_80, %c0_81] : memref<2x10x10x32xf32, #tpu.memory_space<vmem>>, vector<2x8x8x32xf32>
    %60 = vector.shape_cast %59 : vector<2x8x8x32xf32> to vector<128x32xf32>
    %c0_82 = arith.constant 0 : index
    %c0_83 = arith.constant 0 : index
    %c2_84 = arith.constant 2 : index
    %c0_85 = arith.constant 0 : index
    %61 = vector.load %arg8[%c0_82, %c0_83, %c2_84, %c0_85] : memref<2x10x10x32xf32, #tpu.memory_space<vmem>>, vector<2x8x8x32xf32>
    %62 = vector.shape_cast %61 : vector<2x8x8x32xf32> to vector<128x32xf32>
    %c0_86 = arith.constant 0 : index
    %c1_87 = arith.constant 1 : index
    %c0_88 = arith.constant 0 : index
    %c0_89 = arith.constant 0 : index
    %63 = vector.load %arg8[%c0_86, %c1_87, %c0_88, %c0_89] : memref<2x10x10x32xf32, #tpu.memory_space<vmem>>, vector<2x8x8x32xf32>
    %64 = vector.shape_cast %63 : vector<2x8x8x32xf32> to vector<128x32xf32>
    %c0_90 = arith.constant 0 : index
    %c1_91 = arith.constant 1 : index
    %c1_92 = arith.constant 1 : index
    %c0_93 = arith.constant 0 : index
    %65 = vector.load %arg8[%c0_90, %c1_91, %c1_92, %c0_93] : memref<2x10x10x32xf32, #tpu.memory_space<vmem>>, vector<2x8x8x32xf32>
    %66 = vector.shape_cast %65 : vector<2x8x8x32xf32> to vector<128x32xf32>
    %c0_94 = arith.constant 0 : index
    %c1_95 = arith.constant 1 : index
    %c2_96 = arith.constant 2 : index
    %c0_97 = arith.constant 0 : index
    %67 = vector.load %arg8[%c0_94, %c1_95, %c2_96, %c0_97] : memref<2x10x10x32xf32, #tpu.memory_space<vmem>>, vector<2x8x8x32xf32>
    %68 = vector.shape_cast %67 : vector<2x8x8x32xf32> to vector<128x32xf32>
    %c0_98 = arith.constant 0 : index
    %c2_99 = arith.constant 2 : index
    %c0_100 = arith.constant 0 : index
    %c0_101 = arith.constant 0 : index
    %69 = vector.load %arg8[%c0_98, %c2_99, %c0_100, %c0_101] : memref<2x10x10x32xf32, #tpu.memory_space<vmem>>, vector<2x8x8x32xf32>
    %70 = vector.shape_cast %69 : vector<2x8x8x32xf32> to vector<128x32xf32>
    %c0_102 = arith.constant 0 : index
    %c2_103 = arith.constant 2 : index
    %c1_104 = arith.constant 1 : index
    %c0_105 = arith.constant 0 : index
    %71 = vector.load %arg8[%c0_102, %c2_103, %c1_104, %c0_105] : memref<2x10x10x32xf32, #tpu.memory_space<vmem>>, vector<2x8x8x32xf32>
    %72 = vector.shape_cast %71 : vector<2x8x8x32xf32> to vector<128x32xf32>
    %c0_106 = arith.constant 0 : index
    %c2_107 = arith.constant 2 : index
    %c2_108 = arith.constant 2 : index
    %c0_109 = arith.constant 0 : index
    %73 = vector.load %arg8[%c0_106, %c2_107, %c2_108, %c0_109] : memref<2x10x10x32xf32, #tpu.memory_space<vmem>>, vector<2x8x8x32xf32>
    %74 = vector.shape_cast %73 : vector<2x8x8x32xf32> to vector<128x32xf32>
    %75 = tpu.concatenate %58, %60, %62, %64, %66, %68, %70, %72, %74 in 1 : vector<128x32xf32>, vector<128x32xf32>, vector<128x32xf32>, vector<128x32xf32>, vector<128x32xf32>, vector<128x32xf32>, vector<128x32xf32>, vector<128x32xf32>, vector<128x32xf32> -> vector<128x288xf32>
    %76 = arith.truncf %75 : vector<128x288xf32> to vector<128x288xbf16>
    %c0_110 = arith.constant 0 : index
    %c0_111 = arith.constant 0 : index
    %77 = vector.load %arg4[%c0_110, %c0_111] : memref<288x32xbf16, #tpu.memory_space<vmem>>, vector<288x32xbf16>
    %cst_112 = arith.constant dense<0.000000e+00> : vector<128x32xf32>
    %78 = tpu.matmul %76, %77, %cst_112 {dimension_numbers = #tpu.dot_dimension_numbers<[1], [0], [0], [1], [0, 0, 1, 1], [], []>} : vector<128x288xbf16>, vector<288x32xbf16>, vector<128x32xf32> -> vector<128x32xf32>
    %cst_113 = arith.constant dense<0.000000e+00> : vector<32xf32>
    %79 = vector.multi_reduction <add>, %78, %cst_113 [0] : vector<128x32xf32> to vector<32xf32>
    %80 = vector.shape_cast %79 : vector<32xf32> to vector<1x32xf32>
    %cst_114 = arith.constant 1.280000e+02 : f32
    %81 = vector.broadcast %cst_114 : f32 to vector<1x32xf32>
    %82 = arith.divf %80, %81 : vector<1x32xf32>
    %83 = arith.mulf %78, %78 : vector<128x32xf32>
    %cst_115 = arith.constant dense<0.000000e+00> : vector<32xf32>
    %84 = vector.multi_reduction <add>, %83, %cst_115 [0] : vector<128x32xf32> to vector<32xf32>
    %85 = vector.shape_cast %84 : vector<32xf32> to vector<1x32xf32>
    %cst_116 = arith.constant 1.280000e+02 : f32
    %86 = vector.broadcast %cst_116 : f32 to vector<1x32xf32>
    %87 = arith.divf %85, %86 : vector<1x32xf32>
    %88 = arith.mulf %82, %82 : vector<1x32xf32>
    %89 = arith.subf %87, %88 : vector<1x32xf32>
    %90 = vector.broadcast %82 : vector<1x32xf32> to vector<128x32xf32>
    %91 = arith.subf %78, %90 : vector<128x32xf32>
    %cst_117 = arith.constant 9.99999974E-6 : f32
    %92 = vector.broadcast %cst_117 : f32 to vector<1x32xf32>
    %93 = arith.addf %89, %92 : vector<1x32xf32>
    %94 = math.rsqrt %93 : vector<1x32xf32>
    %c0_118 = arith.constant 0 : index
    %c0_119 = arith.constant 0 : index
    %95 = vector.load %arg5[%c0_118, %c0_119] : memref<1x32xf32, #tpu.memory_space<vmem>>, vector<1x32xf32>
    %96 = arith.mulf %94, %95 : vector<1x32xf32>
    %97 = vector.broadcast %96 : vector<1x32xf32> to vector<128x32xf32>
    %98 = arith.mulf %91, %97 : vector<128x32xf32>
    %c0_120 = arith.constant 0 : index
    %c0_121 = arith.constant 0 : index
    %99 = vector.load %arg6[%c0_120, %c0_121] : memref<1x32xf32, #tpu.memory_space<vmem>>, vector<1x32xf32>
    %100 = vector.broadcast %99 : vector<1x32xf32> to vector<128x32xf32>
    %101 = arith.addf %98, %100 : vector<128x32xf32>
    %102 = vector.shape_cast %101 : vector<128x32xf32> to vector<2x8x8x32xf32>
    %103 = arith.addf %102, %0 : vector<2x8x8x32xf32>
    %cst_122 = arith.constant 0.000000e+00 : f32
    %104 = vector.broadcast %cst_122 : f32 to vector<2x8x8x32xf32>
    %105 = arith.maximumf %103, %104 : vector<2x8x8x32xf32>
    %c0_123 = arith.constant 0 : index
    %c0_124 = arith.constant 0 : index
    %c0_125 = arith.constant 0 : index
    %c0_126 = arith.constant 0 : index
    %106 = vector.load %arg7[%c0_123, %c0_124, %c0_125, %c0_126] : memref<2x8x8x32xf32, #tpu.memory_space<vmem>>, vector<2x8x8x32xf32>
    tpu.vector_store %arg7[%c0_123, %c0_124, %c0_125, %c0_126], %105 {strides = array<i32>} : memref<2x8x8x32xf32, #tpu.memory_space<vmem>>, vector<2x8x8x32xf32>,
    return
  }
}

</mosaic_0001>

<bundles_post_ra>
// kernel: resblock_forward.1
= control target key start
LH: loop header
LB: loop body
LE: loop exit
PB: predicated region body
PF: predicated region fallthrough
CT: control target
= control target key end

     0   :  { %vm44_vm0 = vcmask 261120   ;;  %vm56_vm1 = vcmask 253952   ;;  %v3337_v2 = vmov 0.0   ;;  %vm46_vm2 = vcmask 254976   ;;  %s3339_s14 = smov 32   ;;  %s3340_s15 = smov 96   ;;  %s4723_s0 = inlined_call_operand.vmem [shape: f32[2,8,8,32], index: 0, kind: input, shape index: {}]   ;;  %s4724_s1 = inlined_call_operand.vmem [shape: bf16[288,32], index: 1, kind: input, shape index: {}]   ;;  %s4725_s2 = inlined_call_operand.vmem [shape: f32[1,32], index: 2, kind: input, shape index: {}]   ;;  %s4726_s3 = inlined_call_operand.vmem [shape: f32[1,32], index: 3, kind: input, shape index: {}]   ;;  %s4727_s4 = inlined_call_operand.vmem [shape: bf16[288,32], index: 4, kind: input, shape index: {}]   ;;  %s4728_s5 = inlined_call_operand.vmem [shape: f32[1,32], index: 5, kind: input, shape index: {}]   ;;  %s4729_s6 = inlined_call_operand.vmem [shape: f32[1,32], index: 6, kind: input, shape index: {}]   ;;  %s4730_s7 = inlined_call_operand.hbm [shape: f32[2,8,8,32], index: 7, kind: output, shape index: {}]  }
   0x1   :  { %v3387_v0 = vld [vmem:[%s4723_s0 + $0x8] sm:$0xff]  ;;  %v3392_v1 = vld [vmem:[%s4723_s0 + $0x10] sm:$0xff]  ;;  %58 = vst.msk [vmem:[#allocation2 + $0x20] sm:$0x1] %vm56_vm1, %v3337_v2  ;;  %59 = vst.msk [vmem:[#allocation2 + $0x30] sm:$0x1] %vm56_vm1, %v3337_v2 }
   0x2   :  { %90 = vst.msk [vmem:[#allocation2 + $0x21] sm:$0xff] %vm44_vm0, %v3387_v0  ;;  %91 = vst.msk [vmem:[#allocation2 + $0x31] sm:$0xff] %vm44_vm0, %v3392_v1  ;;  %v3437_v3 = vld [vmem:[%s4723_s0] sm:$0xff]  ;;  %v3442_v4 = vld [vmem:[%s4723_s0 + $0x18] sm:$0xff] }
   0x3   :  { %45 = vst.msk [vmem:[#allocation2] sm:$0xff] %vm44_vm0, %v3337_v2  ;;  %48 = vst.msk [vmem:[#allocation2 + $0xa0] sm:$0xff] %vm44_vm0, %v3337_v2  ;;  %v3447_v5 = vld [vmem:[%s4723_s0 + $0x20] sm:$0xff]  ;;  %v3458_v6 = vld [vmem:[%s4723_s0 + $0x28] sm:$0xff] }
   0x4   :  { %51 = vst.msk [vmem:[#allocation2 + $0x90] sm:$0xff] %vm44_vm0, %v3337_v2  ;;  %53 = vst.msk [vmem:[#allocation2 + $0x130] sm:$0xff] %vm44_vm0, %v3337_v2  ;;  %v3463_v7 = vld [vmem:[%s4723_s0 + $0x30] sm:$0xff]  ;;  %v3468_v8 = vld [vmem:[%s4723_s0 + $0x38] sm:$0xff] }
   0x5   :  { %57 = vst.msk [vmem:[#allocation2 + $0x10] sm:$0x1] %vm56_vm1, %v3337_v2  ;;  %60 = vst.msk [vmem:[#allocation2 + $0x40] sm:$0x1] %vm56_vm1, %v3337_v2  ;;  %v3479_v9 = vld [vmem:[%s4723_s0 + $0x40] sm:$0xff]  ;;  %v3484_v10 = vld [vmem:[%s4723_s0 + $0x48] sm:$0xff] }
   0x6   :  { %61 = vst.msk [vmem:[#allocation2 + $0x50] sm:$0x1] %vm56_vm1, %v3337_v2  ;;  %62 = vst.msk [vmem:[#allocation2 + $0x60] sm:$0x1] %vm56_vm1, %v3337_v2  ;;  %v3489_v11 = vld [vmem:[%s4723_s0 + $0x50] sm:$0xff]  ;;  %v3500_v12 = vld [vmem:[%s4723_s0 + $0x58] sm:$0xff] }
   0x7   :  { %63 = vst.msk [vmem:[#allocation2 + $0x70] sm:$0x1] %vm56_vm1, %v3337_v2  ;;  %64 = vst.msk [vmem:[#allocation2 + $0x80] sm:$0x1] %vm56_vm1, %v3337_v2  ;;  %v3505_v13 = vld [vmem:[%s4723_s0 + $0x60] sm:$0xff]  ;;  %v3510_v14 = vld [vmem:[%s4723_s0 + $0x68] sm:$0xff] }
   0x8   :  { %65 = vst.msk [vmem:[#allocation2 + $0xb0] sm:$0x1] %vm56_vm1, %v3337_v2  ;;  %66 = vst.msk [vmem:[#allocation2 + $0xc0] sm:$0x1] %vm56_vm1, %v3337_v2  ;;  %v3521_v15 = vld [vmem:[%s4723_s0 + $0x70] sm:$0xff]  ;;  %v3526_v16 = vld [vmem:[%s4723_s0 + $0x78] sm:$0xff] }
   0x9   :  { %67 = vst.msk [vmem:[#allocation2 + $0xd0] sm:$0x1] %vm56_vm1, %v3337_v2  ;;  %68 = vst.msk [vmem:[#allocation2 + $0xe0] sm:$0x1] %vm56_vm1, %v3337_v2  ;;  %v3272_v17 = vld [vmem:[%s4724_s1 + $0x40] sm:$0xff]   ;;  %v3540_v20 = vld [vmem:[#allocation2 + $0x30] sm:$0xff] }
   0xa   :  { %69 = vst.msk [vmem:[#allocation2 + $0xf0] sm:$0x1] %vm56_vm1, %v3337_v2  ;;  %70 = vst.msk [vmem:[#allocation2 + $0x100] sm:$0x1] %vm56_vm1, %v3337_v2  ;;  %v3273_v18 = vld [vmem:[%s4724_s1] sm:$0xff]   ;;  %2593 = vmatprep.subr.bf16.mxu0 %v3272_v17  ;;  %s3338_s0 = smov 64  }
   0xb   :  { %71 = vst.msk [vmem:[#allocation2 + $0x110] sm:$0x1] %vm56_vm1, %v3337_v2  ;;  %72 = vst.msk [vmem:[#allocation2 + $0x120] sm:$0x1] %vm56_vm1, %v3337_v2  ;;  %v3538_v19 = vld [vmem:[#allocation2 + $0x20] sm:$0xff]  ;;  %2594 = vmatpush3.bf16.msra.mxu0 %v3273_v18  ;;  %v3553_v34 = vld [vmem:[#allocation2 + $0x31] sm:$0xff] }
   0xc   :  { %73 = vst.msk [vmem:[#allocation2 + $0x19] sm:$0x1] %vm56_vm1, %v3337_v2  ;;  %74 = vst.msk [vmem:[#allocation2 + $0x29] sm:$0x1] %vm56_vm1, %v3337_v2  ;;  %v2802_v22 = vpack.i.bf16 %v3540_v20, %v3538_v19  ;;  %v3551_v33 = vld [vmem:[#allocation2 + $0x21] sm:$0xff]  ;;  %v3276_v51 = vld [vmem:[%s4724_s1 + $0x50] sm:$0xff]  }
   0xd   :  { %75 = vst.msk [vmem:[#allocation2 + $0x39] sm:$0x1] %vm56_vm1, %v3337_v2  ;;  %76 = vst.msk [vmem:[#allocation2 + $0x49] sm:$0x1] %vm56_vm1, %v3337_v2  ;;  %v2812_v36 = vpack.i.bf16 %v3553_v34, %v3551_v33  ;;  %v3274_v48 = vld [vmem:[%s4724_s1 + $0x48] sm:$0xff]   ;;  %v3277_v52 = vld [vmem:[%s4724_s1 + $0x10] sm:$0xff]  }
   0xe   :  { %77 = vst.msk [vmem:[#allocation2 + $0x59] sm:$0x1] %vm56_vm1, %v3337_v2  ;;  %78 = vst.msk [vmem:[#allocation2 + $0x69] sm:$0x1] %vm56_vm1, %v3337_v2  ;;  %2803 = vrot.lane.b32.xlu1 %v2802_v22, %s3338_s0  ;;  %v3275_v50 = vld [vmem:[%s4724_s1 + $0x8] sm:$0xff]   ;;  %2595 = vmatprep.subr.bf16.mxu0 %v3274_v48  ;;  %v3278_v53 = vld [vmem:[%s4724_s1 + $0x58] sm:$0xff]  }
   0xf   :  { %79 = vst.msk [vmem:[#allocation2 + $0x79] sm:$0x1] %vm56_vm1, %v3337_v2  ;;  %80 = vst.msk [vmem:[#allocation2 + $0x89] sm:$0x1] %vm56_vm1, %v3337_v2  ;;  %2596 = vmatpush3.bf16.msra.mxu0 %v3275_v50  ;;  %v3279_v57 = vld [vmem:[%s4724_s1 + $0x18] sm:$0xff]   ;;  %v3280_v59 = vld [vmem:[%s4724_s1 + $0x60] sm:$0xff]  }
  0x10   :  { %81 = vst.msk [vmem:[#allocation2 + $0xb9] sm:$0x1] %vm56_vm1, %v3337_v2  ;;  %82 = vst.msk [vmem:[#allocation2 + $0xc9] sm:$0x1] %vm56_vm1, %v3337_v2  ;;  %2597 = vmatprep.subr.bf16.mxu0 %v3276_v51  ;;  %v3281_v63 = vld [vmem:[%s4724_s1 + $0x20] sm:$0xff]  }
  0x11   :  { %83 = vst.msk [vmem:[#allocation2 + $0xd9] sm:$0x1] %vm56_vm1, %v3337_v2  ;;  %84 = vst.msk [vmem:[#allocation2 + $0xe9] sm:$0x1] %vm56_vm1, %v3337_v2  ;;  %v3286_v18 = vld [vmem:[%s4724_s1 + $0x80] sm:$0xff]  }
  0x12   :  { %85 = vst.msk [vmem:[#allocation2 + $0xf9] sm:$0x1] %vm56_vm1, %v3337_v2  ;;  %86 = vst.msk [vmem:[#allocation2 + $0x109] sm:$0x1] %vm56_vm1, %v3337_v2  ;;  %2741 = vmatprep.subr.bf16.mxu1 %v3286_v18 }
  0x13   :  { %87 = vst.msk [vmem:[#allocation2 + $0x119] sm:$0x1] %vm56_vm1, %v3337_v2  ;;  %88 = vst.msk [vmem:[#allocation2 + $0x129] sm:$0x1] %vm56_vm1, %v3337_v2  ;;  %v186_v21 = vld [vmem:[#allocation2 + $0x22] sm:$0xff]  ;;  %2598 = vmatpush3.bf16.msra.mxu0 %v3277_v52  ;;  %2742 = vmatpush3.bf16.msra.mxu1 %v3286_v18 }
  0x14   :  { %89 = vst.msk [vmem:[#allocation2 + $0x11] sm:$0xff] %vm44_vm0, %v3437_v3  ;;  %92 = vst.msk [vmem:[#allocation2 + $0x41] sm:$0xff] %vm44_vm0, %v3442_v4  ;;  %v187_v29 = vld [vmem:[#allocation2 + $0x32] sm:$0xff]  ;;  %2599 = vmatprep.subr.bf16.mxu0 %v3278_v53 }
  0x15   :  { %47 = vst.msk [vmem:[#allocation2 + $0x8] sm:$0x3] %vm46_vm2, %v3337_v2  ;;  %49 = vst.msk [vmem:[#allocation2 + $0xa8] sm:$0x3] %vm46_vm2, %v3337_v2  ;;  %v734_v32 = vpack.c.bf16 %v187_v29, %v186_v21  ;;  %v2837_v41 = vpack.i.bf16 %v187_v29, %v186_v21 }
  0x16   :  { %52 = vst.msk [vmem:[#allocation2 + $0x98] sm:$0x3] %vm46_vm2, %v3337_v2  ;;  %54 = vst.msk [vmem:[#allocation2 + $0x138] sm:$0x3] %vm46_vm2, %v3337_v2  ;;  %v3282_v2 = vld [vmem:[%s4724_s1 + $0x68] sm:$0xff]  }
  0x17   :  { %93 = vst.msk [vmem:[#allocation2 + $0x51] sm:$0xff] %vm44_vm0, %v3447_v5  ;;  %4741 = vst [vmem:[#allocation6_spill] sm:$0xff] %v3463_v7  ;;  %2745 = vmatprep.mubr.msk.bf16.mxu1 %vm44_vm0, %v734_v32  ;;  %2600 = vmatpush3.bf16.msra.mxu0 %v3279_v57  ;;  %v3285_v32 = vld [vmem:[%s4724_s1 + $0x30] sm:$0xff]  }
  0x18   :  { %4742 = vst [vmem:[#allocation7_spill] sm:$0xff] %v3468_v8  ;;  %94 = vst.msk [vmem:[#allocation2 + $0x61] sm:$0xff] %vm44_vm0, %v3458_v6  ;;  %2601 = vmatprep.subr.bf16.mxu0 %v3280_v59 }
  0x19   :  { %95 = vst.msk [vmem:[#allocation2 + $0x71] sm:$0xff] %vm44_vm0, %v3463_v7  ;;  %96 = vst.msk [vmem:[#allocation2 + $0x81] sm:$0xff] %vm44_vm0, %v3468_v8 }
  0x1a   :  { %4743 = vst [vmem:[#allocation8_spill] sm:$0xff] %v3479_v9  ;;  %4744 = vst [vmem:[#allocation9_spill] sm:$0xff] %v3484_v10 }
  0x1b   :  { %4745 = vst [vmem:[#allocation10_spill] sm:$0xff] %v3489_v11  ;;  %97 = vst.msk [vmem:[#allocation2 + $0xb1] sm:$0xff] %vm44_vm0, %v3479_v9  ;;  %v185_v23 = vld [vmem:[#allocation2 + $0x12] sm:$0xff]  ;;  %v3562_v37 = vld [vmem:[#allocation2 + $0x42] sm:$0xff]  ;;  %2602 = vmatpush3.bf16.msra.mxu0 %v3281_v63 }
  0x1c   :  { %98 = vst.msk [vmem:[#allocation2 + $0xc1] sm:$0xff] %vm44_vm0, %v3484_v10  ;;  %99 = vst.msk [vmem:[#allocation2 + $0xd1] sm:$0xff] %vm44_vm0, %v3489_v11  ;;  %v137_v24 = vld [vmem:[#allocation2 + $0x2] sm:$0xff]  ;;  %v2792_v26 = vpack.i.bf16 %v186_v21, %v185_v23  ;;  %v3544_v27 = vld [vmem:[#allocation2 + $0x11] sm:$0xff]  ;;  %v2822_v38 = vpack.i.bf16 %v3562_v37, %v187_v29  ;;  %2603 = vmatprep.subr.bf16.mxu0 %v3282_v2 }
  0x1d   :  { %4746 = vst [vmem:[#allocation11_spill] sm:$0xff] %v3500_v12  ;;  %4747 = vst [vmem:[#allocation12_spill] sm:$0xff] %v3505_v13  ;;  %v121_v25 = vld [vmem:[#allocation2 + $0x1] sm:$0xff]  ;;  %v2807_v28 = vpack.i.bf16 %v185_v23, %v137_v24  ;;  %v3549_v31 = vld [vmem:[#allocation2 + $0x10] sm:$0xff] }
  0x1e   :  { %100 = vst.msk [vmem:[#allocation2 + $0xe1] sm:$0xff] %vm44_vm0, %v3500_v12  ;;  %101 = vst.msk [vmem:[#allocation2 + $0xf1] sm:$0xff] %vm44_vm0, %v3505_v13  ;;  %2793 = vrot.lane.b32.xlu0 %v2792_v26, %s3339_s14  ;;  %v2797_v30 = vpack.i.bf16 %v3544_v27, %v121_v25  ;;  %v2817_v35 = vpack.i.bf16 %v3538_v19, %v3549_v31  ;;  %v3567_v39 = vld [vmem:[#allocation2 + $0x40] sm:$0xff]  ;;  %v3569_v40 = vld [vmem:[#allocation2 + $0x50] sm:$0xff] }
  0x1f   :  { %102 = vst.msk [vmem:[#allocation2 + $0x101] sm:$0xff] %vm44_vm0, %v3510_v14  ;;  %4748 = vst [vmem:[#allocation13_spill] sm:$0xff] %v3521_v15  ;;  %2808 = vrot.lane.b32.xlu1 %v2807_v28, %s3338_s0  ;;  %v2832_v42 = vpack.i.bf16 %v3569_v40, %v3567_v39  ;;  %v3575_v43 = vld [vmem:[#allocation2 + $0x41] sm:$0xff]  ;;  %v3577_v44 = vld [vmem:[#allocation2 + $0x51] sm:$0xff]  ;;  %v2847_v45 = vpack.i.bf16 %v3567_v39, %v3540_v20 }
  0x20   :  { %4749 = vst [vmem:[#allocation14_spill] sm:$0xff] %v3526_v16  ;;  %103 = vst.msk [vmem:[#allocation2 + $0x111] sm:$0xff] %vm44_vm0, %v3521_v15  ;;  %v3582_v46 = vld [vmem:[#allocation2 + $0x52] sm:$0xff]  ;;  %v3584_v47 = vld [vmem:[#allocation2 + $0x62] sm:$0xff]  ;;  %v2842_v49 = vpack.i.bf16 %v3577_v44, %v3575_v43 }
  0x21   :  { %104 = vst.msk [vmem:[#allocation2 + $0x121] sm:$0xff] %vm44_vm0, %v3526_v16  ;;  %v2852_v54 = vpack.i.bf16 %v3584_v47, %v3582_v46  ;;  %v3608_v55 = vld [vmem:[#allocation2 + $0x60] sm:$0xff]  ;;  %v3610_v56 = vld [vmem:[#allocation2 + $0x70] sm:$0xff]  ;;  %v2867_v58 = vpack.i.bf16 %v3582_v46, %v3562_v37  ;;  %v3283_v24 = vld [vmem:[%s4724_s1 + $0x28] sm:$0xff]  }
  0x22   :  { %2798 = vrot.lane.b32.xlu0 %v2797_v30, %s3339_s14  ;;  %v2862_v60 = vpack.i.bf16 %v3610_v56, %v3608_v55  ;;  %v3624_v61 = vld [vmem:[#allocation2 + $0x61] sm:$0xff]  ;;  %v3626_v62 = vld [vmem:[#allocation2 + $0x71] sm:$0xff]  ;;  %v2877_v17 = vpack.i.bf16 %v3608_v55, %v3569_v40  ;;  %2604 = vmatpush3.bf16.msra.mxu0 %v3283_v24 }
  0x23   :  { %2818 = vrot.lane.b32.xlu1 %v2817_v35, %s3340_s15  ;;  %v2872_v21 = vpack.i.bf16 %v3626_v62, %v3624_v61  ;;  %v191_v22 = vld [vmem:[#allocation2 + $0x72] sm:$0xff]  ;;  %v192_v23 = vld [vmem:[#allocation2 + $0x82] sm:$0xff] }
  0x24   :  { %v3289_v25 = vld [vmem:[%s4724_s1 + $0x88] sm:$0xff]   ;;  %v208_v26 = vld [vmem:[#allocation2 + $0x80] sm:$0xff]  ;;  %v209_v28 = vld [vmem:[#allocation2 + $0x90] sm:$0xff]  ;;  %v2882_v30 = vpack.i.bf16 %v192_v23, %v191_v22 }
  0x25   :  { %v3284_v29 = vld [vmem:[%s4724_s1 + $0x70] sm:$0xff]   ;;  %2743 = vmatprep.subr.bf16.mxu1 %v3289_v25  ;;  %v3287_v35 = vld [vmem:[%s4724_s1 + $0x78] sm:$0xff]   ;;  %v2892_v48 = vpack.i.bf16 %v209_v28, %v208_v26  ;;  %v194_v52 = vld [vmem:[#allocation2 + $0xc2] sm:$0xff] }
  0x26   :  { %2813 = vrot.lane.b32.xlu0 %v2812_v36, %s3340_s15  ;;  %2744 = vmatpush3.bf16.msra.mxu1 %v3289_v25  ;;  %v3672_v50 = vld [vmem:[#allocation2 + $0xb1] sm:$0xff] }
  0x27   :  { %2828 = vrot.lane.b32.xlu1 %v2812_v36, %s3339_s14  ;;  %v737_v36 = vpack.c.bf16 %v3582_v46, %v3562_v37  ;;  %2605 = vmatprep.subr.bf16.mxu0 %v3284_v29  ;;  %v241_v37 = vld [vmem:[#allocation2 + $0x92] sm:$0xff]  ;;  %v129_v46 = vld [vmem:[#allocation2 + $0xa1] sm:$0xff] }
  0x28   :  { %2606 = vmatpush3.bf16.msra.mxu0 %v3285_v32  ;;  %v193_v51 = vld [vmem:[#allocation2 + $0xb2] sm:$0xff]  ;;  %v2917_v57 = vpack.i.bf16 %v3672_v50, %v129_v46 }
  0x29   :  { %2746 = vmatmul.mubr.msk.bf16.vlgmr.msra.gmra.mrb[0].mxu1 %vm44_vm0, %v737_v36  ;;  %2607 = vmatprep.subr.bf16.mxu0 %v3287_v35 }
  0x2a   :  { %2823 = vrot.lane.b32.xlu0 %v2822_v38, %s3339_s14  ;;  %v740_v38 = vpack.c.bf16 %v191_v22, %v3584_v47 }
  0x2b   :  { %2838 = vrot.lane.b32.xlu1 %v2837_v41, %s3338_s0  ;;  %v2897_v41 = vpack.i.bf16 %v191_v22, %v3584_v47  ;;  %v2907_v47 = vpack.i.bf16 %v208_v26, %v3610_v56 }
  0x2c   :  { %2749 = vmatprep.mubr.msk.bf16.mxu1 %vm44_vm0, %v740_v38 }
  0x2e   :  { %2833 = vrot.lane.b32.xlu0 %v2832_v42, %s3338_s0  ;;  %v3665_v42 = vld [vmem:[#allocation2 + $0x81] sm:$0xff] }
  0x2f   :  { %2848 = vrot.lane.b32.xlu1 %v2847_v45, %s3340_s15  ;;  %v225_v45 = vld [vmem:[#allocation2 + $0x91] sm:$0xff] }
  0x30   :  { %v2902_v53 = vpack.i.bf16 %v225_v45, %v3665_v42 }
  0x32   :  { %2843 = vrot.lane.b32.xlu0 %v2842_v49, %s3340_s15 }
  0x33   :  { %2858 = vrot.lane.b32.xlu1 %v2842_v49, %s3339_s14  ;;  %v3288_v49 = vld [vmem:[%s4724_s1 + $0x38] sm:$0xff]  }
  0x34   :  { %2608 = vmatpush3.bf16.msra.mxu0 %v3288_v49 }
  0x36   :  { %2853 = vrot.lane.b32.xlu0 %v2852_v54, %s3339_s14  ;;  %v743_v54 = vpack.c.bf16 %v241_v37, %v192_v23 }
  0x37   :  { %2868 = vrot.lane.b32.xlu1 %v2867_v58, %s3338_s0 }
  0x3a   :  { %2863 = vrot.lane.b32.xlu0 %v2862_v60, %s3338_s0 }
  0x3b   :  { %2878 = vrot.lane.b32.xlu1 %v2877_v17, %s3340_s15 }
  0x3e   :  { %2873 = vrot.lane.b32.xlu0 %v2872_v21, %s3340_s15 }
  0x3f   :  { %2888 = vrot.lane.b32.xlu1 %v2872_v21, %s3339_s14 }
  0x42   :  { %2883 = vrot.lane.b32.xlu0 %v2882_v30, %s3339_s14 }
  0x43   :  { %2898 = vrot.lane.b32.xlu1 %v2897_v41, %s3338_s0 }
  0x46   :  { %2893 = vrot.lane.b32.xlu0 %v2892_v48, %s3338_s0 }
  0x47   :  { %2908 = vrot.lane.b32.xlu1 %v2907_v47, %s3340_s15 }
  0x48   :  { %12 = vsyncpa [#allocation4], 0  ;;  %v2912_v58 = vpack.i.bf16 %v194_v52, %v193_v51  ;;  %v145_v59 = vld [vmem:[#allocation2 + $0xa2] sm:$0xff]  ;;  %v3684_v63 = vld [vmem:[#allocation2 + $0xd0] sm:$0xff]  ;;  %2750 = vmatmul.mubr.msk.bf16.gmra.mrb[4].mxu1 %vm44_vm0, %v743_v54  ;;  %vm650_vm3 = vcmask 523264   ;;  %vm667_vm4 = vcmask 785408  }
  0x49   :  { %v3682_v60 = vld [vmem:[#allocation2 + $0xc0] sm:$0xff]  ;;  %v2927_v2 = vpack.i.bf16 %v193_v51, %v145_v59  ;;  %v195_v17 = vld [vmem:[#allocation2 + $0xd2] sm:$0xff] }
  0x4a   :  { %2903 = vrot.lane.b32.xlu0 %v2902_v53, %s3340_s15  ;;  %v2922_v18 = vpack.i.bf16 %v3684_v63, %v3682_v60  ;;  %v3691_v21 = vld [vmem:[#allocation2 + $0xb0] sm:$0xff]  ;;  %v196_v22 = vld [vmem:[#allocation2 + $0xe2] sm:$0xff]  ;;  %v746_v24 = vpack.c.bf16 %v195_v17, %v194_v52  ;;  %v2957_v38 = vpack.i.bf16 %v195_v17, %v194_v52 }
  0x4b   :  { %2918 = vrot.lane.b32.xlu1 %v2917_v57, %s3339_s14  ;;  %v197_v23 = vld [vmem:[#allocation2 + $0xf2] sm:$0xff]  ;;  %v3693_v25 = vld [vmem:[#allocation2 + $0xc1] sm:$0xff]  ;;  %v2937_v29 = vpack.i.bf16 %v3682_v60, %v3691_v21  ;;  %v2942_v32 = vpack.i.bf16 %v196_v22, %v195_v17 }
  0x4c   :  { %v3695_v26 = vld [vmem:[#allocation2 + $0xd1] sm:$0xff]  ;;  %v749_v28 = vpack.c.bf16 %v197_v23, %v196_v22  ;;  %2753 = vmatprep.mubr.msk.bf16.mxu1 %vm44_vm0, %v746_v24  ;;  %v3707_v35 = vld [vmem:[#allocation2 + $0xe0] sm:$0xff]  ;;  %v2987_v53 = vpack.i.bf16 %v197_v23, %v196_v22 }
  0x4d   :  { %v2932_v30 = vpack.i.bf16 %v3695_v26, %v3693_v25  ;;  %v3709_v36 = vld [vmem:[#allocation2 + $0xf0] sm:$0xff]  ;;  %v3715_v45 = vld [vmem:[#allocation2 + $0xe1] sm:$0xff]  ;;  %v2967_v49 = vpack.i.bf16 %v3707_v35, %v3684_v63 }
  0x4e   :  { %2913 = vrot.lane.b32.xlu0 %v2912_v58, %s3339_s14  ;;  %v2952_v41 = vpack.i.bf16 %v3709_v36, %v3707_v35  ;;  %v3717_v48 = vld [vmem:[#allocation2 + $0xf1] sm:$0xff]  ;;  %v198_v46 = vld [vmem:[#allocation2 + $0x102] sm:$0xff] }
  0x4f   :  { %2928 = vrot.lane.b32.xlu1 %v2927_v2, %s3338_s0  ;;  %v2962_v37 = vpack.i.bf16 %v3717_v48, %v3715_v45  ;;  %v2972_v47 = vpack.i.bf16 %v198_v46, %v197_v23  ;;  %v3727_v51 = vld [vmem:[#allocation2 + $0x100] sm:$0xff]  ;;  %v3729_v52 = vld [vmem:[#allocation2 + $0x110] sm:$0xff] }
  0x50   :  { %2754 = vmatmul.mubr.msk.bf16.gmra.mrb[8].mxu1 %vm44_vm0, %v749_v28  ;;  %v199_v54 = vld [vmem:[#allocation2 + $0x112] sm:$0xff]  ;;  %v2982_v57 = vpack.i.bf16 %v3729_v52, %v3727_v51  ;;  %v200_v58 = vld [vmem:[#allocation2 + $0x122] sm:$0xff]  ;;  %v2997_v22 = vpack.i.bf16 %v3727_v51, %v3709_v36 }
  0x51   :  { %v752_v59 = vpack.c.bf16 %v199_v54, %v198_v46  ;;  %v249_v2 = vld [vmem:[#allocation2 + $0x132] sm:$0xff]  ;;  %v3735_v17 = vld [vmem:[#allocation2 + $0x101] sm:$0xff]  ;;  %v3002_v28 = vpack.i.bf16 %v200_v58, %v199_v54 }
  0x52   :  { %2923 = vrot.lane.b32.xlu0 %v2922_v18, %s3338_s0  ;;  %v3737_v18 = vld [vmem:[#allocation2 + $0x111] sm:$0xff]  ;;  %v755_v24 = vpack.c.bf16 %v249_v2, %v200_v58 }
  0x53   :  { %2938 = vrot.lane.b32.xlu1 %v2937_v29, %s3340_s15  ;;  %2757 = vmatprep.mubr.msk.bf16.mxu1 %vm44_vm0, %v752_v59  ;;  %v2992_v23 = vpack.i.bf16 %v3737_v18, %v3735_v17  ;;  %v216_v29 = vld [vmem:[#allocation2 + $0x120] sm:$0xff] }
  0x54   :  { %v105_v59 = vld [vmem:[#allocation2] sm:$0xff] }
  0x56   :  { %2933 = vrot.lane.b32.xlu0 %v2932_v30, %s3340_s15 }
  0x57   :  { %2948 = vrot.lane.b32.xlu1 %v2932_v30, %s3339_s14  ;;  %v217_v30 = vld [vmem:[#allocation2 + $0x130] sm:$0xff] }
  0x58   :  { %2758 = vmatmul.mubr.msk.bf16.gmra.mrb[12].mxu1 %vm44_vm0, %v755_v24 }
  0x5a   :  { %2943 = vrot.lane.b32.xlu0 %v2942_v32, %s3339_s14  ;;  %v3017_v32 = vpack.i.bf16 %v199_v54, %v198_v46 }
  0x5b   :  { %2958 = vrot.lane.b32.xlu1 %v2957_v38, %s3338_s0  ;;  %v3012_v38 = vpack.i.bf16 %v217_v30, %v216_v29 }
  0x5e   :  { %2953 = vrot.lane.b32.xlu0 %v2952_v41, %s3338_s0  ;;  %v3751_v41 = vld [vmem:[#allocation2 + $0x121] sm:$0xff] }
  0x5f   :  { %2968 = vrot.lane.b32.xlu1 %v2967_v49, %s3340_s15  ;;  %v233_v49 = vld [vmem:[#allocation2 + $0x131] sm:$0xff] }
  0x62   :  { %2963 = vrot.lane.b32.xlu0 %v2962_v37, %s3340_s15 }
  0x63   :  { %2978 = vrot.lane.b32.xlu1 %v2962_v37, %s3339_s14  ;;  %v3027_v37 = vpack.i.bf16 %v216_v29, %v3729_v52 }
  0x66   :  { %2973 = vrot.lane.b32.xlu0 %v2972_v47, %s3339_s14  ;;  %v3022_v47 = vpack.i.bf16 %v233_v49, %v3751_v41 }
  0x67   :  { %2988 = vrot.lane.b32.xlu1 %v2987_v53, %s3338_s0 }
  0x6a   :  { %2983 = vrot.lane.b32.xlu0 %v2982_v57, %s3338_s0 }
  0x6b   :  { %2998 = vrot.lane.b32.xlu1 %v2997_v22, %s3340_s15 }
  0x6e   :  { %2993 = vrot.lane.b32.xlu0 %v2992_v23, %s3340_s15 }
  0x6f   :  { %3008 = vrot.lane.b32.xlu1 %v2992_v23, %s3339_s14 }
  0x72   :  { %3003 = vrot.lane.b32.xlu0 %v3002_v28, %s3339_s14 }
  0x73   :  { %3018 = vrot.lane.b32.xlu1 %v3017_v32, %s3338_s0 }
  0x76   :  { %3013 = vrot.lane.b32.xlu0 %v3012_v38, %s3338_s0 }
  0x77   :  { %3028 = vrot.lane.b32.xlu1 %v3027_v37, %s3340_s15 }
  0x7a   :  { %3023 = vrot.lane.b32.xlu0 %v3022_v47, %s3340_s15 }
  0x80   :  { %v2804_v53 = vpop.permute.xlu1 %2803 }
  0x81   :  { %v2806_v29 = vunpack.i.h.bf16 %v2804_v53  ;;  %v2805_v30 = vunpack.i.l.bf16 %v2804_v53 }
  0x90   :  { %v2794_v46 = vpop.permute.xlu0 %2793 }
  0x91   :  { %v2796_v54 = vunpack.i.h.bf16 %v2794_v46  ;;  %v2795_v57 = vunpack.i.l.bf16 %v2794_v46  ;;  %v2809_v58 = vpop.permute.xlu1 %2808 }
  0x92   :  { %v2811_v24 = vunpack.i.h.bf16 %v2809_v58  ;;  %v2810_v22 = vunpack.i.l.bf16 %v2809_v58 }
  0x93   :  { %v684_v37 = vsel %vm44_vm0, %v3544_v27, %v2795_v57  ;;  %v685_v47 = vsel %vm44_vm0, %v3551_v33, %v2796_v54 }
  0x94   :  { %v2799_v2 = vpop.permute.xlu0 %2798 }
  0x95   :  { %v2801_v23 = vunpack.i.h.bf16 %v2799_v2  ;;  %v2800_v28 = vunpack.i.l.bf16 %v2799_v2  ;;  %v2819_v49 = vpop.permute.xlu1 %2818 }
  0x96   :  { %v2821_v46 = vunpack.i.h.bf16 %v2819_v49  ;;  %v2820_v58 = vunpack.i.l.bf16 %v2819_v49 }
  0x97   :  { %v634_v32 = vsel %vm44_vm0, %v105_v59, %v2800_v28  ;;  %v635_v38 = vsel %vm44_vm0, %v3549_v31, %v2801_v23  ;;  %v700_v59 = vsel %vm650_vm3, %v684_v37, %v2805_v30  ;;  %v701_v31 = vsel %vm650_vm3, %v685_v47, %v2806_v29 }
  0x98   :  { %v2814_v16 = vpop.permute.xlu0 %2813  ;;  %v651_v53 = vsel %vm650_vm3, %v634_v32, %v2810_v22  ;;  %v652_v13 = vsel %vm650_vm3, %v635_v38, %v2811_v24 }
  0x99   :  { %v2816_v2 = vunpack.i.h.bf16 %v2814_v16  ;;  %v2815_v15 = vunpack.i.l.bf16 %v2814_v16  ;;  %v668_v23 = vsel %vm667_vm4, %v651_v53, %v2820_v58  ;;  %v669_v27 = vsel %vm667_vm4, %v652_v13, %v2821_v46  ;;  %v2829_v57 = vpop.permute.xlu1 %2828 }
  0x9a   :  { %v732_v28 = vpack.c.bf16 %v669_v27, %v668_v23  ;;  %v2831_v22 = vunpack.i.h.bf16 %v2829_v57  ;;  %v2830_v32 = vunpack.i.l.bf16 %v2829_v57 }
  0x9b   :  { %v716_v33 = vsel %vm667_vm4, %v700_v59, %v2815_v15  ;;  %v717_v54 = vsel %vm667_vm4, %v701_v31, %v2816_v2 }
  0x9c   :  { %v2824_v49 = vpop.permute.xlu0 %2823  ;;  %v733_v16 = vpack.c.bf16 %v717_v54, %v716_v33  ;;  %v637_v15 = vsel %vm44_vm0, %v3540_v20, %v2831_v22  ;;  %v636_v46 = vsel %vm44_vm0, %v3538_v19, %v2830_v32 }
  0x9d   :  { %v2839_v24 = vpop.permute.xlu1 %2838  ;;  %v2826_v30 = vunpack.i.h.bf16 %v2824_v49  ;;  %v2825_v38 = vunpack.i.l.bf16 %v2824_v49 }
  0x9e   :  { %956 = vmatprep.mubr.bf16.mxu0 %v733_v16  ;;  %v2841_v37 = vunpack.i.h.bf16 %v2839_v24  ;;  %v2840_v47 = vunpack.i.l.bf16 %v2839_v24 }
  0x9f   :  { %957 = vmatmul.mubr.bf16.vlgmr.msra.gmra.mrb[0].mxu0 %v732_v28  ;;  %v687_v53 = vsel %vm44_vm0, %v3575_v43, %v2826_v30  ;;  %v686_v59 = vsel %vm44_vm0, %v3553_v34, %v2825_v38 }
  0xa0   :  { %v2834_v29 = vpop.permute.xlu0 %2833  ;;  %v653_v57 = vsel %vm650_vm3, %v636_v46, %v2840_v47  ;;  %v654_v33 = vsel %vm650_vm3, %v637_v15, %v2841_v37 }
  0xa1   :  { %v2836_v58 = vunpack.i.h.bf16 %v2834_v29  ;;  %v2835_v13 = vunpack.i.l.bf16 %v2834_v29  ;;  %v2849_v2 = vpop.permute.xlu1 %2848 }
  0xa2   :  { %v2851_v31 = vunpack.i.h.bf16 %v2849_v2  ;;  %v2850_v23 = vunpack.i.l.bf16 %v2849_v2 }
  0xa3   :  { %v702_v20 = vsel %vm650_vm3, %v686_v59, %v2835_v13  ;;  %v703_v19 = vsel %vm650_vm3, %v687_v53, %v2836_v58 }
  0xa4   :  { %v2844_v27 = vpop.permute.xlu0 %2843  ;;  %v670_v49 = vsel %vm667_vm4, %v653_v57, %v2850_v23  ;;  %v671_v43 = vsel %vm667_vm4, %v654_v33, %v2851_v31 }
  0xa5   :  { %v2846_v54 = vunpack.i.h.bf16 %v2844_v27  ;;  %v2845_v28 = vunpack.i.l.bf16 %v2844_v27  ;;  %v2859_v16 = vpop.permute.xlu1 %2858  ;;  %v735_v32 = vpack.c.bf16 %v671_v43, %v670_v49 }
  0xa6   :  { %v2861_v38 = vunpack.i.h.bf16 %v2859_v16  ;;  %v2860_v29 = vunpack.i.l.bf16 %v2859_v16 }
  0xa7   :  { %v718_v34 = vsel %vm667_vm4, %v702_v20, %v2845_v28  ;;  %v719_v22 = vsel %vm667_vm4, %v703_v19, %v2846_v54 }
  0xa8   :  { %v2854_v24 = vpop.permute.xlu0 %2853  ;;  %v736_v30 = vpack.c.bf16 %v719_v22, %v718_v34  ;;  %v639_v59 = vsel %vm44_vm0, %v3569_v40, %v2861_v38  ;;  %v638_v31 = vsel %vm44_vm0, %v3567_v39, %v2860_v29 }
  0xa9   :  { %v2869_v37 = vpop.permute.xlu1 %2868  ;;  %v2856_v47 = vunpack.i.h.bf16 %v2854_v24  ;;  %v2855_v13 = vunpack.i.l.bf16 %v2854_v24 }
  0xaa   :  { %964 = vmatprep.mubr.bf16.mxu0 %v736_v30  ;;  %v2871_v15 = vunpack.i.h.bf16 %v2869_v37  ;;  %v2870_v46 = vunpack.i.l.bf16 %v2869_v37 }
  0xab   :  { %965 = vmatmul.mubr.bf16.gmra.mrb[4].mxu0 %v735_v32  ;;  %v689_v27 = vsel %vm44_vm0, %v3624_v61, %v2856_v47  ;;  %v688_v57 = vsel %vm44_vm0, %v3577_v44, %v2855_v13 }
  0xac   :  { %v2864_v58 = vpop.permute.xlu0 %2863  ;;  %v655_v20 = vsel %vm650_vm3, %v638_v31, %v2870_v46  ;;  %v656_v19 = vsel %vm650_vm3, %v639_v59, %v2871_v15 }
  0xad   :  { %v2866_v2 = vunpack.i.h.bf16 %v2864_v58  ;;  %v2865_v53 = vunpack.i.l.bf16 %v2864_v58  ;;  %v2879_v23 = vpop.permute.xlu1 %2878 }
  0xae   :  { %v2881_v33 = vunpack.i.h.bf16 %v2879_v23  ;;  %v2880_v54 = vunpack.i.l.bf16 %v2879_v23 }
  0xaf   :  { %v704_v40 = vsel %vm650_vm3, %v688_v57, %v2865_v53  ;;  %v705_v39 = vsel %vm650_vm3, %v689_v27, %v2866_v2 }
  0xb0   :  { %v2874_v28 = vpop.permute.xlu0 %2873  ;;  %v672_v16 = vsel %vm667_vm4, %v655_v20, %v2880_v54  ;;  %v673_v61 = vsel %vm667_vm4, %v656_v19, %v2881_v33 }
  0xb1   :  { %v2876_v49 = vunpack.i.h.bf16 %v2874_v28  ;;  %v2875_v43 = vunpack.i.l.bf16 %v2874_v28  ;;  %v2889_v34 = vpop.permute.xlu1 %2888  ;;  %v738_v32 = vpack.c.bf16 %v673_v61, %v672_v16 }
  0xb2   :  { %v2891_v38 = vunpack.i.h.bf16 %v2889_v34  ;;  %v2890_v29 = vunpack.i.l.bf16 %v2889_v34 }
  0xb3   :  { %v720_v44 = vsel %vm667_vm4, %v704_v40, %v2875_v43  ;;  %v721_v22 = vsel %vm667_vm4, %v705_v39, %v2876_v49 }
  0xb4   :  { %v2884_v24 = vpop.permute.xlu0 %2883  ;;  %v739_v30 = vpack.c.bf16 %v721_v22, %v720_v44  ;;  %v641_v59 = vsel %vm44_vm0, %v3610_v56, %v2891_v38  ;;  %v640_v31 = vsel %vm44_vm0, %v3608_v55, %v2890_v29 }
  0xb5   :  { %v2899_v37 = vpop.permute.xlu1 %2898  ;;  %v2886_v47 = vunpack.i.h.bf16 %v2884_v24  ;;  %v2885_v13 = vunpack.i.l.bf16 %v2884_v24 }
  0xb6   :  { %972 = vmatprep.mubr.bf16.mxu0 %v739_v30  ;;  %v2901_v15 = vunpack.i.h.bf16 %v2899_v37  ;;  %v2900_v46 = vunpack.i.l.bf16 %v2899_v37  ;;  %v113_v30 = vld [vmem:[#allocation2 + $0xa0] sm:$0xff] }
  0xb7   :  { %973 = vmatmul.mubr.bf16.gmra.mrb[8].mxu0 %v738_v32  ;;  %v691_v27 = vsel %vm44_vm0, %v3665_v42, %v2886_v47  ;;  %v690_v57 = vsel %vm44_vm0, %v3626_v62, %v2885_v13 }
  0xb8   :  { %v2894_v58 = vpop.permute.xlu0 %2893  ;;  %v657_v20 = vsel %vm650_vm3, %v640_v31, %v2900_v46  ;;  %v658_v19 = vsel %vm650_vm3, %v641_v59, %v2901_v15 }
  0xb9   :  { %v2896_v2 = vunpack.i.h.bf16 %v2894_v58  ;;  %v2895_v53 = vunpack.i.l.bf16 %v2894_v58  ;;  %v2909_v23 = vpop.permute.xlu1 %2908 }
  0xba   :  { %v2911_v33 = vunpack.i.h.bf16 %v2909_v23  ;;  %v2910_v54 = vunpack.i.l.bf16 %v2909_v23 }
  0xbb   :  { %v706_v56 = vsel %vm650_vm3, %v690_v57, %v2895_v53  ;;  %v707_v55 = vsel %vm650_vm3, %v691_v27, %v2896_v2 }
  0xbc   :  { %v2904_v28 = vpop.permute.xlu0 %2903  ;;  %v674_v40 = vsel %vm667_vm4, %v657_v20, %v2910_v54  ;;  %v675_v42 = vsel %vm667_vm4, %v658_v19, %v2911_v33 }
  0xbd   :  { %v2906_v49 = vunpack.i.h.bf16 %v2904_v28  ;;  %v2905_v43 = vunpack.i.l.bf16 %v2904_v28  ;;  %v2919_v39 = vpop.permute.xlu1 %2918  ;;  %v741_v61 = vpack.c.bf16 %v675_v42, %v674_v40 }
  0xbe   :  { %v2921_v22 = vunpack.i.h.bf16 %v2919_v39  ;;  %v2920_v32 = vunpack.i.l.bf16 %v2919_v39 }
  0xbf   :  { %v722_v62 = vsel %vm667_vm4, %v706_v56, %v2905_v43  ;;  %v723_v16 = vsel %vm667_vm4, %v707_v55, %v2906_v49 }
  0xc0   :  { %v2914_v34 = vpop.permute.xlu0 %2913  ;;  %v742_v44 = vpack.c.bf16 %v723_v16, %v722_v62  ;;  %v643_v46 = vsel %vm44_vm0, %v3691_v21, %v2921_v22  ;;  %v642_v2 = vsel %vm44_vm0, %v113_v30, %v2920_v32 }
  0xc1   :  { %v2929_v24 = vpop.permute.xlu1 %2928  ;;  %v2916_v38 = vunpack.i.h.bf16 %v2914_v34  ;;  %v2915_v29 = vunpack.i.l.bf16 %v2914_v34 }
  0xc2   :  { %980 = vmatprep.mubr.bf16.mxu0 %v742_v44  ;;  %v2931_v47 = vunpack.i.h.bf16 %v2929_v24  ;;  %v2930_v13 = vunpack.i.l.bf16 %v2929_v24 }
  0xc3   :  { %981 = vmatmul.mubr.bf16.gmra.mrb[12].mxu0 %v741_v61  ;;  %v693_v59 = vsel %vm44_vm0, %v3693_v25, %v2916_v38  ;;  %v692_v31 = vsel %vm44_vm0, %v3672_v50, %v2915_v29 }
  0xc4   :  { %v2924_v37 = vpop.permute.xlu0 %2923  ;;  %v659_v33 = vsel %vm650_vm3, %v642_v2, %v2930_v13  ;;  %v660_v54 = vsel %vm650_vm3, %v643_v46, %v2931_v47 }
  0xc5   :  { %v2926_v58 = vunpack.i.h.bf16 %v2924_v37  ;;  %v2925_v15 = vunpack.i.l.bf16 %v2924_v37  ;;  %v2939_v53 = vpop.permute.xlu1 %2938 }
  0xc6   :  { %v2941_v23 = vunpack.i.h.bf16 %v2939_v53  ;;  %v2940_v27 = vunpack.i.l.bf16 %v2939_v53 }
  0xc7   :  { %v708_v21 = vsel %vm650_vm3, %v692_v31, %v2925_v15  ;;  %v709_v19 = vsel %vm650_vm3, %v693_v59, %v2926_v58 }
  0xc8   :  { %v2934_v57 = vpop.permute.xlu0 %2933  ;;  %v676_v49 = vsel %vm667_vm4, %v659_v33, %v2940_v27  ;;  %v677_v25 = vsel %vm667_vm4, %v660_v54, %v2941_v23 }
  0xc9   :  { %v2936_v28 = vunpack.i.h.bf16 %v2934_v57  ;;  %v2935_v20 = vunpack.i.l.bf16 %v2934_v57  ;;  %v2949_v43 = vpop.permute.xlu1 %2948  ;;  %v744_v55 = vpack.c.bf16 %v677_v25, %v676_v49 }
  0xca   :  { %v2951_v39 = vunpack.i.h.bf16 %v2949_v43  ;;  %v2950_v62 = vunpack.i.l.bf16 %v2949_v43 }
  0xcb   :  { %v724_v50 = vsel %vm667_vm4, %v708_v21, %v2935_v20  ;;  %v725_v56 = vsel %vm667_vm4, %v709_v19, %v2936_v28 }
  0xcc   :  { %v2944_v40 = vpop.permute.xlu0 %2943  ;;  %v745_v42 = vpack.c.bf16 %v725_v56, %v724_v50  ;;  %v645_v38 = vsel %vm44_vm0, %v3684_v63, %v2951_v39  ;;  %v644_v29 = vsel %vm44_vm0, %v3682_v60, %v2950_v62 }
  0xcd   :  { %v2959_v16 = vpop.permute.xlu1 %2958  ;;  %v2946_v61 = vunpack.i.h.bf16 %v2944_v40  ;;  %v2945_v34 = vunpack.i.l.bf16 %v2944_v40 }
  0xce   :  { %988 = vmatprep.mubr.bf16.mxu0 %v745_v42  ;;  %v2961_v22 = vunpack.i.h.bf16 %v2959_v16  ;;  %v2960_v32 = vunpack.i.l.bf16 %v2959_v16 }
  0xcf   :  { %989 = vmatmul.mubr.bf16.gmra.mrb[16].mxu0 %v744_v55  ;;  %v695_v47 = vsel %vm44_vm0, %v3715_v45, %v2946_v61  ;;  %v694_v13 = vsel %vm44_vm0, %v3695_v26, %v2945_v34 }
  0xd0   :  { %v2954_v44 = vpop.permute.xlu0 %2953  ;;  %v661_v2 = vsel %vm650_vm3, %v644_v29, %v2960_v32  ;;  %v662_v53 = vsel %vm650_vm3, %v645_v38, %v2961_v22 }
  0xd1   :  { %v2956_v24 = vunpack.i.h.bf16 %v2954_v44  ;;  %v2955_v30 = vunpack.i.l.bf16 %v2954_v44  ;;  %v2969_v37 = vpop.permute.xlu1 %2968 }
  0xd2   :  { %v2971_v58 = vunpack.i.h.bf16 %v2969_v37  ;;  %v2970_v15 = vunpack.i.l.bf16 %v2969_v37 }
  0xd3   :  { %v710_v63 = vsel %vm650_vm3, %v694_v13, %v2955_v30  ;;  %v711_v60 = vsel %vm650_vm3, %v695_v47, %v2956_v24 }
  0xd4   :  { %v2964_v46 = vpop.permute.xlu0 %2963  ;;  %v678_v23 = vsel %vm667_vm4, %v661_v2, %v2970_v15  ;;  %v679_v45 = vsel %vm667_vm4, %v662_v53, %v2971_v58 }
  0xd5   :  { %v2966_v59 = vunpack.i.h.bf16 %v2964_v46  ;;  %v2965_v31 = vunpack.i.l.bf16 %v2964_v46  ;;  %v2979_v27 = vpop.permute.xlu1 %2978  ;;  %v747_v33 = vpack.c.bf16 %v679_v45, %v678_v23 }
  0xd6   :  { %v2981_v20 = vunpack.i.h.bf16 %v2979_v27  ;;  %v2980_v21 = vunpack.i.l.bf16 %v2979_v27 }
  0xd7   :  { %v726_v26 = vsel %vm667_vm4, %v710_v63, %v2965_v31  ;;  %v727_v57 = vsel %vm667_vm4, %v711_v60, %v2966_v59 }
  0xd8   :  { %v2974_v54 = vpop.permute.xlu0 %2973  ;;  %v748_v28 = vpack.c.bf16 %v727_v57, %v726_v26  ;;  %v647_v42 = vsel %vm44_vm0, %v3709_v36, %v2981_v20  ;;  %v646_v39 = vsel %vm44_vm0, %v3707_v35, %v2980_v21 }
  0xd9   :  { %v2989_v19 = vpop.permute.xlu1 %2988  ;;  %v2976_v49 = vunpack.i.h.bf16 %v2974_v54  ;;  %v2975_v25 = vunpack.i.l.bf16 %v2974_v54 }
  0xda   :  { %996 = vmatprep.mubr.bf16.mxu0 %v748_v28  ;;  %v2991_v50 = vunpack.i.h.bf16 %v2989_v19  ;;  %v2990_v56 = vunpack.i.l.bf16 %v2989_v19 }
  0xdb   :  { %997 = vmatmul.mubr.bf16.gmra.mrb[20].mxu0 %v747_v33  ;;  %v697_v16 = vsel %vm44_vm0, %v3735_v17, %v2976_v49  ;;  %v696_v61 = vsel %vm44_vm0, %v3717_v48, %v2975_v25 }
  0xdc   :  { %v2984_v43 = vpop.permute.xlu0 %2983  ;;  %v663_v32 = vsel %vm650_vm3, %v646_v39, %v2990_v56  ;;  %v664_v24 = vsel %vm650_vm3, %v647_v42, %v2991_v50 }
  0xdd   :  { %v2986_v55 = vunpack.i.h.bf16 %v2984_v43  ;;  %v2985_v40 = vunpack.i.l.bf16 %v2984_v43  ;;  %v2999_v62 = vpop.permute.xlu1 %2998 }
  0xde   :  { %v3001_v34 = vunpack.i.h.bf16 %v2999_v62  ;;  %v3000_v44 = vunpack.i.l.bf16 %v2999_v62 }
  0xdf   :  { %v712_v36 = vsel %vm650_vm3, %v696_v61, %v2985_v40  ;;  %v713_v35 = vsel %vm650_vm3, %v697_v16, %v2986_v55 }
  0xe0   :  { %v2994_v22 = vpop.permute.xlu0 %2993  ;;  %v680_v29 = vsel %vm667_vm4, %v663_v32, %v3000_v44  ;;  %v681_v17 = vsel %vm667_vm4, %v664_v24, %v3001_v34 }
  0xe1   :  { %v2996_v30 = vunpack.i.h.bf16 %v2994_v22  ;;  %v2995_v38 = vunpack.i.l.bf16 %v2994_v22  ;;  %v3009_v37 = vpop.permute.xlu1 %3008  ;;  %v750_v13 = vpack.c.bf16 %v681_v17, %v680_v29 }
  0xe2   :  { %v3011_v46 = vunpack.i.h.bf16 %v3009_v37  ;;  %v3010_v2 = vunpack.i.l.bf16 %v3009_v37 }
  0xe3   :  { %v728_v48 = vsel %vm667_vm4, %v712_v36, %v2995_v38  ;;  %v729_v47 = vsel %vm667_vm4, %v713_v35, %v2996_v30 }
  0xe4   :  { %v3004_v58 = vpop.permute.xlu0 %3003  ;;  %v751_v15 = vpack.c.bf16 %v729_v47, %v728_v48  ;;  %v649_v26 = vsel %vm44_vm0, %v3729_v52, %v3011_v46  ;;  %v648_v57 = vsel %vm44_vm0, %v3727_v51, %v3010_v2 }
  0xe5   :  { %v3019_v53 = vpop.permute.xlu1 %3018  ;;  %v3006_v59 = vunpack.i.h.bf16 %v3004_v58  ;;  %v3005_v31 = vunpack.i.l.bf16 %v3004_v58 }
  0xe6   :  { %1004 = vmatprep.mubr.bf16.mxu0 %v751_v15  ;;  %v3021_v60 = vunpack.i.h.bf16 %v3019_v53  ;;  %v3020_v23 = vunpack.i.l.bf16 %v3019_v53 }
  0xe7   :  { %1005 = vmatmul.mubr.bf16.gmra.mrb[24].mxu0 %v750_v13  ;;  %v699_v54 = vsel %vm44_vm0, %v3751_v41, %v3006_v59  ;;  %v698_v28 = vsel %vm44_vm0, %v3737_v18, %v3005_v31 }
  0xe8   :  { %v3014_v63 = vpop.permute.xlu0 %3013  ;;  %v665_v49 = vsel %vm650_vm3, %v648_v57, %v3020_v23  ;;  %v666_v25 = vsel %vm650_vm3, %v649_v26, %v3021_v60  ;;  %v3920_v23 = vld [vmem:[%s4727_s4 + $0x80] sm:$0xff]  }
  0xe9   :  { %v3016_v45 = vunpack.i.h.bf16 %v3014_v63  ;;  %v3015_v27 = vunpack.i.l.bf16 %v3014_v63  ;;  %v3029_v33 = vpop.permute.xlu1 %3028  ;;  %2761 = vmatprep.subr.bf16.mxu0 %v3920_v23 }
  0xea   :  { %v3031_v20 = vunpack.i.h.bf16 %v3029_v33  ;;  %v3030_v21 = vunpack.i.l.bf16 %v3029_v33  ;;  %2762 = vmatpush3.bf16.msra.mxu0 %v3920_v23 }
  0xeb   :  { %v714_v52 = vsel %vm650_vm3, %v698_v28, %v3015_v27  ;;  %v715_v51 = vsel %vm650_vm3, %v699_v54, %v3016_v45  ;;  %v3925_v45 = vld [vmem:[%s4727_s4 + $0x88] sm:$0xff]  }
  0xec   :  { %v3024_v19 = vpop.permute.xlu0 %3023  ;;  %v682_v56 = vsel %vm667_vm4, %v665_v49, %v3030_v21  ;;  %v683_v41 = vsel %vm667_vm4, %v666_v25, %v3031_v20  ;;  %2763 = vmatprep.subr.bf16.mxu0 %v3925_v45 }
  0xed   :  { %v3026_v43 = vunpack.i.h.bf16 %v3024_v19  ;;  %v3025_v50 = vunpack.i.l.bf16 %v3024_v19  ;;  %v753_v40 = vpack.c.bf16 %v683_v41, %v682_v56 }
  0xee   :  { %2764 = vmatpush3.bf16.msra.mxu0 %v3925_v45 }
  0xef   :  { %v730_v55 = vsel %vm667_vm4, %v714_v52, %v3025_v50  ;;  %v731_v18 = vsel %vm667_vm4, %v715_v51, %v3026_v43 }
  0xf0   :  { %v754_v42 = vpack.c.bf16 %v731_v18, %v730_v55 }
  0xf2   :  { %1012 = vmatprep.mubr.bf16.mxu0 %v754_v42 }
  0xf3   :  { %1013 = vmatmul.mubr.bf16.gmra.mrb[28].mxu0 %v753_v40 }
  0xfc   :  { %v2747_v39 = vpop.f32.mrb[0].mxu1 }
  0xfd   :  { %v1055_v62 = vpop.f32.mrb[1].mxu1 }
  0xfe   :  { %v2748_v16 = vpop.f32.mrb[2].mxu1 }
  0xff   :  { %v1058_v61 = vpop.f32.mrb[3].mxu1 }
 0x11b   :  { %v3885_v34 = vpop.f32.mrb[4].mxu1 }
 0x11c   :  { %v1071_v44 = vpop.f32.mrb[5].mxu1 }
 0x11d   :  { %v3887_v22 = vpop.f32.mrb[6].mxu1 }
 0x11e   :  { %v1074_v32 = vpop.f32.mrb[7].mxu1 }
 0x123   :  { %v3889_v24 = vpop.f32.mrb[8].mxu1 }
 0x124   :  { %v3891_v30 = vpop.f32.mrb[9].mxu1 }
 0x125   :  { %v3893_v38 = vpop.f32.mrb[10].mxu1 }
 0x126   :  { %v3895_v36 = vpop.f32.mrb[11].mxu1 }
 0x12b   :  { %v3897_v35 = vpop.f32.mrb[12].mxu1 }
 0x12c   :  { %v3899_v29 = vpop.f32.mrb[13].mxu1 }
 0x12d   :  { %v3901_v17 = vpop.f32.mrb[14].mxu1 }
 0x12e   :  { %v3903_v37 = vpop.f32.mrb[15].mxu1 }
 0x172   :  { %v2609_v48 = vpop.f32.mrb[0].mxu0 }
 0x173   :  { %v2610_v47 = vpop.f32.mrb[1].mxu0 }
 0x174   :  { %v2611_v13 = vadd.f32 %v2610_v47, %v2609_v48  ;;  %v2612_v58 = vpop.f32.mrb[2].mxu0 }
 0x175   :  { %v2613_v15 = vpop.f32.mrb[3].mxu0 }
 0x176   :  { %v2614_v46 = vadd.f32 %v2613_v15, %v2612_v58  ;;  %v3905_v2 = vadd.f32 %v2611_v13, %v1055_v62 }
 0x178   :  { %v1157_v53 = vmul.f32 %v3905_v2, %v3905_v2  ;;  %v3909_v59 = vadd.f32 %v2614_v46, %v1058_v61  ;;  %v1118_v31 = vsel %vm44_vm0, %v3905_v2, 0.0 }
 0x17a   :  { %v1119_v63 = vsel %vm44_vm0, %v3909_v59, 0.0  ;;  %v1158_v60 = vmul.f32 %v3909_v59, %v3909_v59  ;;  %v1173_v26 = vsel %vm44_vm0, %v1157_v53, 0.0 }
 0x17b   :  { %v1120_v27 = vadd.f32 %v1119_v63, %v1118_v31 }
 0x17c   :  { %v1174_v57 = vsel %vm44_vm0, %v1158_v60, 0.0 }
 0x17d   :  { %v1175_v33 = vadd.f32 %v1174_v57, %v1173_v26 }
 0x17e   :  { %v2615_v54 = vpop.f32.mrb[4].mxu0 }
 0x17f   :  { %v2616_v28 = vpop.f32.mrb[5].mxu0 }
 0x180   :  { %v2617_v20 = vadd.f32 %v2616_v28, %v2615_v54  ;;  %v2618_v21 = vpop.f32.mrb[6].mxu0 }
 0x181   :  { %v2619_v19 = vpop.f32.mrb[7].mxu0 }
 0x182   :  { %v3933_v49 = vadd.f32 %v2747_v39, %v2617_v20  ;;  %v2620_v25 = vadd.f32 %v2619_v19, %v2618_v21 }
 0x184   :  { %v1121_v43 = vsel %vm44_vm0, %v3933_v49, 0.0  ;;  %v1159_v50 = vmul.f32 %v3933_v49, %v3933_v49  ;;  %v3939_v52 = vadd.f32 %v2748_v16, %v2620_v25 }
 0x185   :  { %v1122_v51 = vadd.f32 %v1121_v43, %v1120_v27 }
 0x186   :  { %v1176_v56 = vsel %vm44_vm0, %v1159_v50, 0.0  ;;  %v1123_v41 = vsel %vm44_vm0, %v3939_v52, 0.0  ;;  %v1160_v55 = vmul.f32 %v3939_v52, %v3939_v52 }
 0x187   :  { %v1177_v18 = vadd.f32 %v1176_v56, %v1175_v33  ;;  %v1124_v40 = vadd.f32 %v1123_v41, %v1122_v51 }
 0x188   :  { %v1178_v42 = vsel %vm44_vm0, %v1160_v55, 0.0 }
 0x189   :  { %v1179_v39 = vadd.f32 %v1178_v42, %v1177_v18 }
 0x18a   :  { %v2621_v62 = vpop.f32.mrb[8].mxu0 }
 0x18b   :  { %v2622_v61 = vpop.f32.mrb[9].mxu0 }
 0x18c   :  { %v2623_v48 = vadd.f32 %v2622_v61, %v2621_v62  ;;  %v2624_v47 = vpop.f32.mrb[10].mxu0 }
 0x18d   :  { %v2625_v16 = vpop.f32.mrb[11].mxu0 }
 0x18e   :  { %v2626_v13 = vadd.f32 %v2625_v16, %v2624_v47  ;;  %v3947_v58 = vadd.f32 %v2623_v48, %v1071_v44 }
 0x190   :  { %v1125_v15 = vsel %vm44_vm0, %v3947_v58, 0.0  ;;  %v1161_v46 = vmul.f32 %v3947_v58, %v3947_v58  ;;  %v3953_v53 = vadd.f32 %v2626_v13, %v1074_v32 }
 0x191   :  { %v1126_v31 = vadd.f32 %v1125_v15, %v1124_v40 }
 0x192   :  { %v1180_v63 = vsel %vm44_vm0, %v1161_v46, 0.0  ;;  %v1127_v60 = vsel %vm44_vm0, %v3953_v53, 0.0  ;;  %v1162_v27 = vmul.f32 %v3953_v53, %v3953_v53 }
 0x193   :  { %v1181_v26 = vadd.f32 %v1180_v63, %v1179_v39  ;;  %v1128_v44 = vadd.f32 %v1127_v60, %v1126_v31 }
 0x194   :  { %v1182_v57 = vsel %vm44_vm0, %v1162_v27, 0.0 }
 0x195   :  { %v1183_v33 = vadd.f32 %v1182_v57, %v1181_v26 }
 0x196   :  { %v2627_v54 = vpop.f32.mrb[12].mxu0 }
 0x197   :  { %v2628_v28 = vpop.f32.mrb[13].mxu0 }
 0x198   :  { %v2629_v20 = vadd.f32 %v2628_v28, %v2627_v54  ;;  %v2630_v21 = vpop.f32.mrb[14].mxu0 }
 0x199   :  { %v2631_v32 = vpop.f32.mrb[15].mxu0 }
 0x19a   :  { %v3962_v19 = vadd.f32 %v3885_v34, %v2629_v20  ;;  %v2632_v25 = vadd.f32 %v2631_v32, %v2630_v21 }
 0x19c   :  { %v1129_v43 = vsel %vm44_vm0, %v3962_v19, 0.0  ;;  %v1163_v50 = vmul.f32 %v3962_v19, %v3962_v19  ;;  %v3969_v51 = vadd.f32 %v3887_v22, %v2632_v25 }
 0x19d   :  { %v1130_v56 = vadd.f32 %v1129_v43, %v1128_v44 }
 0x19e   :  { %v1184_v41 = vsel %vm44_vm0, %v1163_v50, 0.0  ;;  %v1131_v55 = vsel %vm44_vm0, %v3969_v51, 0.0  ;;  %v1164_v34 = vmul.f32 %v3969_v51, %v3969_v51 }
 0x19f   :  { %v1185_v18 = vadd.f32 %v1184_v41, %v1183_v33  ;;  %v1132_v40 = vadd.f32 %v1131_v55, %v1130_v56 }
 0x1a0   :  { %v1186_v42 = vsel %vm44_vm0, %v1164_v34, 0.0 }
 0x1a1   :  { %v1187_v39 = vadd.f32 %v1186_v42, %v1185_v18 }
 0x1a2   :  { %v2633_v62 = vpop.f32.mrb[16].mxu0 }
 0x1a3   :  { %v2634_v61 = vpop.f32.mrb[17].mxu0 }
 0x1a4   :  { %v2635_v48 = vadd.f32 %v2634_v61, %v2633_v62  ;;  %v2636_v47 = vpop.f32.mrb[18].mxu0 }
 0x1a5   :  { %v2637_v22 = vpop.f32.mrb[19].mxu0 }
 0x1a6   :  { %v2638_v16 = vadd.f32 %v2637_v22, %v2636_v47  ;;  %v3978_v13 = vadd.f32 %v2635_v48, %v3891_v30 }
 0x1a8   :  { %v1133_v15 = vsel %vm44_vm0, %v3978_v13, 0.0  ;;  %v1165_v46 = vmul.f32 %v3978_v13, %v3978_v13  ;;  %v3985_v31 = vadd.f32 %v2638_v16, %v3895_v36 }
 0x1a9   :  { %v1134_v63 = vadd.f32 %v1133_v15, %v1132_v40 }
 0x1aa   :  { %v1188_v60 = vsel %vm44_vm0, %v1165_v46, 0.0  ;;  %v1135_v27 = vsel %vm44_vm0, %v3985_v31, 0.0  ;;  %v1166_v26 = vmul.f32 %v3985_v31, %v3985_v31 }
 0x1ab   :  { %v1189_v30 = vadd.f32 %v1188_v60, %v1187_v39  ;;  %v1136_v44 = vadd.f32 %v1135_v27, %v1134_v63 }
 0x1ac   :  { %v1190_v57 = vsel %vm44_vm0, %v1166_v26, 0.0 }
 0x1ad   :  { %v1191_v33 = vadd.f32 %v1190_v57, %v1189_v30 }
 0x1ae   :  { %v2639_v54 = vpop.f32.mrb[20].mxu0 }
 0x1af   :  { %v2640_v28 = vpop.f32.mrb[21].mxu0 }
 0x1b0   :  { %v2641_v20 = vadd.f32 %v2640_v28, %v2639_v54  ;;  %v2642_v21 = vpop.f32.mrb[22].mxu0 }
 0x1b1   :  { %v2643_v36 = vpop.f32.mrb[23].mxu0 }
 0x1b2   :  { %v3994_v32 = vadd.f32 %v3889_v24, %v2641_v20  ;;  %v2644_v25 = vadd.f32 %v2643_v36, %v2642_v21 }
 0x1b4   :  { %v1137_v43 = vsel %vm44_vm0, %v3994_v32, 0.0  ;;  %v1167_v50 = vmul.f32 %v3994_v32, %v3994_v32  ;;  %v4001_v56 = vadd.f32 %v3893_v38, %v2644_v25 }
 0x1b5   :  { %v1138_v41 = vadd.f32 %v1137_v43, %v1136_v44 }
 0x1b6   :  { %v1192_v55 = vsel %vm44_vm0, %v1167_v50, 0.0  ;;  %v1139_v34 = vsel %vm44_vm0, %v4001_v56, 0.0  ;;  %v1168_v24 = vmul.f32 %v4001_v56, %v4001_v56 }
 0x1b7   :  { %v1193_v18 = vadd.f32 %v1192_v55, %v1191_v33  ;;  %v1140_v40 = vadd.f32 %v1139_v34, %v1138_v41 }
 0x1b8   :  { %v1194_v42 = vsel %vm44_vm0, %v1168_v24, 0.0 }
 0x1b9   :  { %v1195_v39 = vadd.f32 %v1194_v42, %v1193_v18 }
 0x1ba   :  { %v2645_v62 = vpop.f32.mrb[24].mxu0 }
 0x1bb   :  { %v2646_v61 = vpop.f32.mrb[25].mxu0 }
 0x1bc   :  { %v2647_v48 = vadd.f32 %v2646_v61, %v2645_v62  ;;  %v2648_v47 = vpop.f32.mrb[26].mxu0 }
 0x1bd   :  { %v2649_v38 = vpop.f32.mrb[27].mxu0 }
 0x1be   :  { %v2650_v22 = vadd.f32 %v2649_v38, %v2648_v47  ;;  %v4010_v16 = vadd.f32 %v2647_v48, %v3899_v29 }
 0x1c0   :  { %v1141_v15 = vsel %vm44_vm0, %v4010_v16, 0.0  ;;  %v1169_v46 = vmul.f32 %v4010_v16, %v4010_v16  ;;  %v4017_v63 = vadd.f32 %v2650_v22, %v3903_v37 }
 0x1c1   :  { %v1142_v60 = vadd.f32 %v1141_v15, %v1140_v40 }
 0x1c2   :  { %v1196_v27 = vsel %vm44_vm0, %v1169_v46, 0.0  ;;  %v1143_v26 = vsel %vm44_vm0, %v4017_v63, 0.0  ;;  %v1170_v30 = vmul.f32 %v4017_v63, %v4017_v63 }
 0x1c3   :  { %v1197_v29 = vadd.f32 %v1196_v27, %v1195_v39  ;;  %v1144_v44 = vadd.f32 %v1143_v26, %v1142_v60 }
 0x1c4   :  { %v1198_v57 = vsel %vm44_vm0, %v1170_v30, 0.0 }
 0x1c5   :  { %v1199_v33 = vadd.f32 %v1198_v57, %v1197_v29 }
 0x1c6   :  { %v2651_v54 = vpop.f32.mrb[28].mxu0 }
 0x1c7   :  { %v2652_v28 = vpop.f32.mrb[29].mxu0 }
 0x1c8   :  { %v2653_v20 = vadd.f32 %v2652_v28, %v2651_v54  ;;  %v2654_v21 = vpop.f32.mrb[30].mxu0 }
 0x1c9   :  { %v2655_v37 = vpop.f32.mrb[31].mxu0 }
 0x1ca   :  { %v4026_v36 = vadd.f32 %v3897_v35, %v2653_v20  ;;  %v2656_v25 = vadd.f32 %v2655_v37, %v2654_v21 }
 0x1cc   :  { %v1145_v43 = vsel %vm44_vm0, %v4026_v36, 0.0  ;;  %v1171_v50 = vmul.f32 %v4026_v36, %v4026_v36  ;;  %v4033_v41 = vadd.f32 %v3901_v17, %v2656_v25 }
 0x1cd   :  { %v1146_v55 = vadd.f32 %v1145_v43, %v1144_v44 }
 0x1ce   :  { %v1200_v34 = vsel %vm44_vm0, %v1171_v50, 0.0  ;;  %v1147_v24 = vsel %vm44_vm0, %v4033_v41, 0.0  ;;  %v1172_v35 = vmul.f32 %v4033_v41, %v4033_v41 }
 0x1cf   :  { %v1201_v18 = vadd.f32 %v1200_v34, %v1199_v33  ;;  %v1148_v40 = vadd.f32 %v1147_v24, %v1146_v55 }
 0x1d0   :  { %v1202_v42 = vsel %vm44_vm0, %v1172_v35, 0.0  ;;  %v3295_v35 = vld [vmem:[%s4727_s4 + $0x8] sm:$0xff]  }
 0x1d1   :  { %v1149_v39 = vrot.slane %v1148_v40, 4  ;;  %v1203_v62 = vadd.f32 %v1202_v42, %v1201_v18  ;;  %v3296_v18 = vld [vmem:[%s4727_s4 + $0x50] sm:$0xff]  }
 0x1d2   :  { %v3297_v42 = vld [vmem:[%s4727_s4 + $0x10] sm:$0xff]  }
 0x1d3   :  { %v1150_v61 = vadd.f32 %v1149_v39, %v1148_v40  ;;  %v1204_v48 = vrot.slane %v1203_v62, 4  ;;  %v1233_v40 = vlaneseq  ;;  %v3298_v39 = vld [vmem:[%s4727_s4 + $0x58] sm:$0xff]  }
 0x1d5   :  { %v1151_v47 = vrot.slane %v1150_v61, 2  ;;  %v1205_v17 = vadd.f32 %v1204_v48, %v1203_v62  ;;  %v4098_v62 = vshrl.u32 %v1233_v40, 7  ;;  %v1231_v48 = vld [vmem:[%s4725_s2] sm:$0x1] }
 0x1d7   :  { %v1152_v38 = vadd.f32 %v1151_v47, %v1150_v61  ;;  %v1206_v22 = vrot.slane %v1205_v17, 2  ;;  %v3299_v61 = vld [vmem:[%s4727_s4 + $0x18] sm:$0xff]   ;;  %v3300_v47 = vld [vmem:[%s4727_s4 + $0x60] sm:$0xff]  }
 0x1d9   :  { %v1153_v15 = vrot.slane %v1152_v38, 1  ;;  %v1207_v46 = vadd.f32 %v1206_v22, %v1205_v17  ;;  %v4734_v17 = vsub.s32 0, %v4098_v62 }
 0x1db   :  { %v1154_v60 = vadd.f32 %v1153_v15, %v1152_v38  ;;  %v1208_v27 = vrot.slane %v1207_v46, 1  ;;  %v3301_v15 = vld [vmem:[%s4727_s4 + $0x20] sm:$0xff]  }
 0x1dd   :  { %v4041_v26 = vmul.f32 0.0078125, %v1154_v60  ;;  %v1209_v30 = vadd.f32 %v1208_v27, %v1207_v46  ;;  %v2565_v60 = vld [vmem:[%s4726_s3] ss:$0 sm:$0xff] }
 0x1df   :  { %v1210_v29 = vmul.f32 0.0078125, %v1209_v30  ;;  %v1211_v44 = vmul.f32 %v4041_v26, %v4041_v26  ;;  %v1228_v57 = vsub.f32 %v4033_v41, %v4041_v26  ;;  %v1214_v33 = vsub.f32 %v3909_v59, %v4041_v26 }
 0x1e0   :  { %v1215_v54 = vsub.f32 %v3933_v49, %v4041_v26  ;;  %v1213_v28 = vsub.f32 %v3905_v2, %v4041_v26  ;;  %v1216_v20 = vsub.f32 %v3939_v52, %v4041_v26  ;;  %v1217_v21 = vsub.f32 %v3947_v58, %v4041_v26  ;;  %v3292_v2 = vld [vmem:[%s4727_s4 + $0x40] sm:$0xff]   ;;  %v3294_v52 = vld [vmem:[%s4727_s4 + $0x48] sm:$0xff]  }
 0x1e1   :  { %v1212_v37 = vsub.f32 %v1210_v29, %v1211_v44  ;;  %v1218_v25 = vsub.f32 %v3953_v53, %v4041_v26  ;;  %v1219_v43 = vsub.f32 %v3962_v19, %v4041_v26  ;;  %v1220_v59 = vsub.f32 %v3969_v51, %v4041_v26  ;;  %v3293_v49 = vld [vmem:[%s4727_s4] sm:$0xff]   ;;  %2667 = vmatprep.subr.bf16.mxu1 %v3292_v2  ;;  %v3303_v51 = vld [vmem:[%s4727_s4 + $0x28] sm:$0xff]  }
 0x1e2   :  { %v1222_v58 = vsub.f32 %v3985_v31, %v4041_v26  ;;  %v1223_v53 = vsub.f32 %v3994_v32, %v4041_v26  ;;  %v1224_v19 = vsub.f32 %v4001_v56, %v4041_v26  ;;  %v1225_v50 = vsub.f32 %v4010_v16, %v4041_v26  ;;  %2668 = vmatpush3.bf16.msra.mxu1 %v3293_v49 }
 0x1e3   :  { %v1229_v41 = vadd.f32 1e-05, %v1212_v37  ;;  %v1221_v55 = vsub.f32 %v3978_v13, %v4041_v26  ;;  %v1226_v34 = vsub.f32 %v4017_v63, %v4041_v26  ;;  %v1227_v24 = vsub.f32 %v4026_v36, %v4041_v26  ;;  %2669 = vmatprep.subr.bf16.mxu1 %v3294_v52  ;;  %v3304_v63 = vld [vmem:[%s4727_s4 + $0x70] sm:$0xff]  }
 0x1e4   :  { %v3305_v36 = vld [vmem:[%s4727_s4 + $0x30] sm:$0xff]  }
 0x1e5   :  { %3308 = vrsqrt.f32 %v1229_v41 }
 0x1e6   :  { %2670 = vmatpush3.bf16.msra.mxu1 %v3295_v35 }
 0x1e7   :  { %2671 = vmatprep.subr.bf16.mxu1 %v3296_v18 }
 0x1ea   :  { %2672 = vmatpush3.bf16.msra.mxu1 %v3297_v42 }
 0x1eb   :  { %2673 = vmatprep.subr.bf16.mxu1 %v3298_v39 }
 0x1ee   :  { %2674 = vmatpush3.bf16.msra.mxu1 %v3299_v61 }
 0x1ef   :  { %v3309_v38 = vpop.eup %3308  ;;  %2675 = vmatprep.subr.bf16.mxu1 %v3300_v47 }
 0x1f0   :  { %v1232_v22 = vmul.f32 %v3309_v38, %v1231_v48 }
 0x1f2   :  { %v1236_v46 = vrot.slane %v1232_v22, %v4734_v17  ;;  %2676 = vmatpush3.bf16.msra.mxu1 %v3301_v15 }
 0x1f4   :  { %v1252_v27 = vmul.f32 %v1236_v46, %v1228_v57  ;;  %v1238_v30 = vmul.f32 %v1236_v46, %v1214_v33  ;;  %v1239_v29 = vmul.f32 %v1236_v46, %v1215_v54  ;;  %v1237_v44 = vmul.f32 %v1236_v46, %v1213_v28 }
 0x1f5   :  { %v1240_v37 = vmul.f32 %v1236_v46, %v1216_v20  ;;  %v1241_v2 = vmul.f32 %v1236_v46, %v1217_v21  ;;  %v1242_v49 = vmul.f32 %v1236_v46, %v1218_v25  ;;  %v1243_v52 = vmul.f32 %v1236_v46, %v1219_v43 }
 0x1f6   :  { %v1275_v41 = vadd.f32 %v2565_v60, %v1252_v27  ;;  %v1261_v35 = vadd.f32 %v2565_v60, %v1238_v30  ;;  %v1262_v18 = vadd.f32 %v2565_v60, %v1239_v29  ;;  %v1260_v40 = vadd.f32 %v2565_v60, %v1237_v44  ;;  %v3302_v27 = vld [vmem:[%s4727_s4 + $0x68] sm:$0xff]  }
 0x1f7   :  { %v1263_v42 = vadd.f32 %v2565_v60, %v1240_v37  ;;  %v1264_v39 = vadd.f32 %v2565_v60, %v1241_v2  ;;  %v1265_v61 = vadd.f32 %v2565_v60, %v1242_v49  ;;  %v1266_v48 = vadd.f32 %v2565_v60, %v1243_v52  ;;  %2677 = vmatprep.subr.bf16.mxu1 %v3302_v27  ;;  %v1324_v49 = vld [vmem:[#allocation2 + $0x1] sm:$0xff] }
 0x1f8   :  { %v1291_v47 = vmax.f32 %v1275_v41, 0.0  ;;  %v1277_v38 = vmax.f32 %v1261_v35, 0.0  ;;  %v1278_v22 = vmax.f32 %v1262_v18, 0.0  ;;  %v1276_v57 = vmax.f32 %v1260_v40, 0.0  ;;  %2678 = vmatpush3.bf16.msra.mxu1 %v3303_v51 }
 0x1f9   :  { %v1279_v33 = vmax.f32 %v1263_v42, 0.0  ;;  %v1280_v54 = vmax.f32 %v1264_v39, 0.0  ;;  %v1281_v28 = vmax.f32 %v1265_v61, 0.0  ;;  %v1282_v15 = vmax.f32 %v1266_v48, 0.0  ;;  %2679 = vmatprep.subr.bf16.mxu1 %v3304_v63 }
 0x1fa   :  { %1307 = vst.msk [vmem:[#allocation2 + $0x121] sm:$0xff] %vm44_vm0, %v1291_v47  ;;  %1293 = vst.msk [vmem:[#allocation2 + $0x21] sm:$0xff] %vm44_vm0, %v1277_v38  ;;  %v1244_v20 = vmul.f32 %v1236_v46, %v1220_v59  ;;  %v1246_v21 = vmul.f32 %v1236_v46, %v1222_v58  ;;  %v1247_v25 = vmul.f32 %v1236_v46, %v1223_v53 }
 0x1fb   :  { %1294 = vst.msk [vmem:[#allocation2 + $0x31] sm:$0xff] %vm44_vm0, %v1278_v22  ;;  %1292 = vst.msk [vmem:[#allocation2 + $0x11] sm:$0xff] %vm44_vm0, %v1276_v57  ;;  %v1248_v43 = vmul.f32 %v1236_v46, %v1224_v19  ;;  %v1249_v31 = vmul.f32 %v1236_v46, %v1225_v50  ;;  %v1245_v32 = vmul.f32 %v1236_v46, %v1221_v55 }
 0x1fc   :  { %1295 = vst.msk [vmem:[#allocation2 + $0x41] sm:$0xff] %vm44_vm0, %v1279_v33  ;;  %1296 = vst.msk [vmem:[#allocation2 + $0x51] sm:$0xff] %vm44_vm0, %v1280_v54  ;;  %v1250_v56 = vmul.f32 %v1236_v46, %v1226_v34  ;;  %v1251_v59 = vmul.f32 %v1236_v46, %v1227_v24  ;;  %v1267_v58 = vadd.f32 %v2565_v60, %v1244_v20  ;;  %2680 = vmatpush3.bf16.msra.mxu1 %v3305_v36  ;;  %v1340_v54 = vld [vmem:[#allocation2 + $0x2] sm:$0xff] }
 0x1fd   :  { %1297 = vst.msk [vmem:[#allocation2 + $0x61] sm:$0xff] %vm44_vm0, %v1281_v28  ;;  %1298 = vst.msk [vmem:[#allocation2 + $0x71] sm:$0xff] %vm44_vm0, %v1282_v15  ;;  %v1269_v53 = vadd.f32 %v2565_v60, %v1246_v21  ;;  %v1270_v19 = vadd.f32 %v2565_v60, %v1247_v25  ;;  %v1271_v30 = vadd.f32 %v2565_v60, %v1248_v43 }
 0x1fe   :  { %v1272_v29 = vadd.f32 %v2565_v60, %v1249_v31  ;;  %v1268_v16 = vadd.f32 %v2565_v60, %v1245_v32  ;;  %v1273_v50 = vadd.f32 %v2565_v60, %v1250_v56  ;;  %v1274_v44 = vadd.f32 %v2565_v60, %v1251_v59  ;;  %v3312_v56 = vld [vmem:[#allocation2 + $0x92] sm:$0xff] }
 0x1ff   :  { %v1283_v13 = vmax.f32 %v1267_v58, 0.0  ;;  %v1285_v55 = vmax.f32 %v1269_v53, 0.0  ;;  %v1286_v37 = vmax.f32 %v1270_v19, 0.0  ;;  %v1287_v2 = vmax.f32 %v1271_v30, 0.0 }
 0x200   :  { %v1288_v26 = vmax.f32 %v1272_v29, 0.0  ;;  %v1284_v34 = vmax.f32 %v1268_v16, 0.0  ;;  %v1289_v24 = vmax.f32 %v1273_v50, 0.0  ;;  %v1290_v46 = vmax.f32 %v1274_v44, 0.0 }
 0x201   :  { %1299 = vst.msk [vmem:[#allocation2 + $0x81] sm:$0xff] %vm44_vm0, %v1283_v13  ;;  %1301 = vst.msk [vmem:[#allocation2 + $0xc1] sm:$0xff] %vm44_vm0, %v1285_v55  ;;  %v4166_v60 = vld [vmem:[#allocation2 + $0x22] sm:$0xff]  ;;  %v3306_v55 = vld [vmem:[%s4727_s4 + $0x78] sm:$0xff]  }
 0x202   :  { %1302 = vst.msk [vmem:[#allocation2 + $0xd1] sm:$0xff] %vm44_vm0, %v1286_v37  ;;  %1303 = vst.msk [vmem:[#allocation2 + $0xe1] sm:$0xff] %vm44_vm0, %v1287_v2  ;;  %v4168_v52 = vld [vmem:[#allocation2 + $0x32] sm:$0xff]  ;;  %v4190_v22 = vld [vmem:[#allocation2 + $0x20] sm:$0xff]  ;;  %2681 = vmatprep.subr.bf16.mxu1 %v3306_v55 }
 0x203   :  { %v1388_v41 = vld [vmem:[#allocation2 + $0x12] sm:$0xff]  ;;  %1304 = vst.msk [vmem:[#allocation2 + $0xf1] sm:$0xff] %vm44_vm0, %v1288_v26  ;;  %1300 = vst.msk [vmem:[#allocation2 + $0xb1] sm:$0xff] %vm44_vm0, %v1284_v34  ;;  %v1934_v35 = vpack.c.bf16 %v4168_v52, %v4166_v60  ;;  %v4179_v42 = vld [vmem:[#allocation2 + $0x42] sm:$0xff]  ;;  %v3077_v63 = vpack.i.bf16 %v4168_v52, %v4166_v60 }
 0x204   :  { %1305 = vst.msk [vmem:[#allocation2 + $0x101] sm:$0xff] %vm44_vm0, %v1289_v24  ;;  %1306 = vst.msk [vmem:[#allocation2 + $0x111] sm:$0xff] %vm44_vm0, %v1290_v46  ;;  %v3032_v18 = vpack.i.bf16 %v4166_v60, %v1388_v41  ;;  %v4177_v40 = vld [vmem:[#allocation2 + $0x11] sm:$0xff]  ;;  %v4186_v47 = vld [vmem:[#allocation2 + $0x62] sm:$0xff]  ;;  %v3047_v15 = vpack.i.bf16 %v1388_v41, %v1340_v54  ;;  %v3062_v53 = vpack.i.bf16 %v4179_v42, %v4168_v52 }
 0x205   :  { %v4181_v39 = vld [vmem:[#allocation2 + $0x52] sm:$0xff]  ;;  %v3037_v61 = vpack.i.bf16 %v4177_v40, %v1324_v49  ;;  %2765 = vmatprep.mubr.msk.bf16.mxu0 %vm44_vm0, %v1934_v35  ;;  %v4203_v20 = vld [vmem:[#allocation2 + $0x21] sm:$0xff] }
 0x206   :  { %v1937_v48 = vpack.c.bf16 %v4181_v39, %v4179_v42  ;;  %v4188_v38 = vld [vmem:[#allocation2 + $0x72] sm:$0xff]  ;;  %3033 = vrot.lane.b32.xlu0 %v3032_v18, %s3339_s14  ;;  %v4229_v30 = vld [vmem:[#allocation2 + $0x40] sm:$0xff]  ;;  %v3092_v49 = vpack.i.bf16 %v4186_v47, %v4181_v39  ;;  %v3107_v35 = vpack.i.bf16 %v4181_v39, %v4179_v42 }
 0x207   :  { %v1940_v57 = vpack.c.bf16 %v4188_v38, %v4186_v47  ;;  %v4196_v33 = vld [vmem:[#allocation2 + $0x30] sm:$0xff]  ;;  %3038 = vrot.lane.b32.xlu1 %v3037_v61, %s3339_s14  ;;  %v3307_v37 = vld [vmem:[%s4727_s4 + $0x38] sm:$0xff]   ;;  %v4255_v26 = vld [vmem:[#allocation2 + $0x41] sm:$0xff] }
 0x208   :  { %2766 = vmatmul.mubr.msk.bf16.vlgmr.msra.gmra.mrb[32].mxu0 %vm44_vm0, %v1937_v48  ;;  %v3042_v28 = vpack.i.bf16 %v4196_v33, %v4190_v22  ;;  %v4205_v21 = vld [vmem:[#allocation2 + $0x31] sm:$0xff]  ;;  %v1442_v43 = vld [vmem:[#allocation2 + $0x82] sm:$0xff]  ;;  %2682 = vmatpush3.bf16.msra.mxu1 %v3307_v37  ;;  %v3087_v46 = vpack.i.bf16 %v4229_v30, %v4196_v33 }
 0x209   :  { %2769 = vmatprep.mubr.msk.bf16.mxu0 %vm44_vm0, %v1940_v57  ;;  %v4208_v25 = vld [vmem:[#allocation2 + $0x10] sm:$0xff]  ;;  %v4211_v27 = vld [vmem:[#allocation2 + $0xc2] sm:$0xff]  ;;  %v3052_v31 = vpack.i.bf16 %v4205_v21, %v4203_v20  ;;  %v1943_v59 = vpack.c.bf16 %v3312_v56, %v1442_v43  ;;  %2781 = vmatprep.subr.bf16.mxu1 %v3920_v23  ;;  %v3122_v42 = vpack.i.bf16 %v1442_v43, %v4188_v38 }
 0x20a   :  { %3043 = vrot.lane.b32.xlu0 %v3042_v28, %s3338_s0  ;;  %v4213_v51 = vld [vmem:[#allocation2 + $0xd2] sm:$0xff]  ;;  %v3057_v32 = vpack.i.bf16 %v4190_v22, %v4208_v25  ;;  %v4236_v50 = vld [vmem:[#allocation2 + $0xe2] sm:$0xff] }
 0x20b   :  { %3048 = vrot.lane.b32.xlu1 %v3047_v15, %s3338_s0  ;;  %v1946_v58 = vpack.c.bf16 %v4213_v51, %v4211_v27  ;;  %v4227_v19 = vld [vmem:[#allocation2 + $0x102] sm:$0xff]  ;;  %v4231_v29 = vld [vmem:[#allocation2 + $0x50] sm:$0xff]  ;;  %v3137_v15 = vpack.i.bf16 %v4188_v38, %v4186_v47 }
 0x20c   :  { %v4233_v16 = vld [vmem:[#allocation2 + $0x112] sm:$0xff]  ;;  %v3072_v2 = vpack.i.bf16 %v4231_v29, %v4229_v30  ;;  %v4271_v60 = vld [vmem:[#allocation2 + $0x60] sm:$0xff] }
 0x20d   :  { %v4238_v44 = vld [vmem:[#allocation2 + $0xf2] sm:$0xff]  ;;  %v4281_v18 = vld [vmem:[#allocation2 + $0x61] sm:$0xff]  ;;  %v3117_v57 = vpack.i.bf16 %v4271_v60, %v4231_v29 }
 0x20e   :  { %3053 = vrot.lane.b32.xlu0 %v3052_v31, %s3340_s15  ;;  %v1949_v36 = vpack.c.bf16 %v4238_v44, %v4236_v50  ;;  %v4257_v34 = vld [vmem:[#allocation2 + $0x51] sm:$0xff]  ;;  %v1410_v39 = vld [vmem:[#allocation2 + $0x80] sm:$0xff] }
 0x20f   :  { %3058 = vrot.lane.b32.xlu1 %v3057_v32, %s3340_s15  ;;  %v3082_v24 = vpack.i.bf16 %v4257_v34, %v4255_v26  ;;  %v4273_v52 = vld [vmem:[#allocation2 + $0x70] sm:$0xff]  ;;  %v4310_v55 = vld [vmem:[#allocation2 + $0xc0] sm:$0xff] }
 0x210   :  { %2770 = vmatmul.mubr.msk.bf16.gmra.mrb[36].mxu0 %vm44_vm0, %v1943_v59  ;;  %v3102_v41 = vpack.i.bf16 %v4273_v52, %v4271_v60  ;;  %v4283_v61 = vld [vmem:[#allocation2 + $0x71] sm:$0xff]  ;;  %v3147_v43 = vpack.i.bf16 %v1410_v39, %v4273_v52  ;;  %v1308_v13 = vld [vmem:[#allocation2] sm:$0xff] }
 0x211   :  { %2773 = vmatprep.mubr.msk.bf16.mxu0 %vm44_vm0, %v1946_v58  ;;  %v3112_v48 = vpack.i.bf16 %v4283_v61, %v4281_v18  ;;  %v1411_v54 = vld [vmem:[#allocation2 + $0x90] sm:$0xff]  ;;  %v1332_v58 = vld [vmem:[#allocation2 + $0xa1] sm:$0xff] }
 0x212   :  { %3063 = vrot.lane.b32.xlu0 %v3062_v53, %s3339_s14  ;;  %v3132_v28 = vpack.i.bf16 %v1411_v54, %v1410_v39  ;;  %v1427_v32 = vld [vmem:[#allocation2 + $0x91] sm:$0xff]  ;;  %v3197_v54 = vpack.i.bf16 %v4213_v51, %v4211_v27 }
 0x213   :  { %3068 = vrot.lane.b32.xlu1 %v3052_v31, %s3339_s14  ;;  %v4298_v31 = vld [vmem:[#allocation2 + $0x81] sm:$0xff]  ;;  %v1396_v59 = vld [vmem:[#allocation2 + $0xb2] sm:$0xff] }
 0x214   :  { %v3142_v56 = vpack.i.bf16 %v1427_v32, %v4298_v31  ;;  %v4305_v53 = vld [vmem:[#allocation2 + $0xb1] sm:$0xff]  ;;  %v3152_v47 = vpack.i.bf16 %v4211_v27, %v1396_v59  ;;  %v3212_v27 = vpack.i.bf16 %v4227_v19, %v4238_v44 }
 0x215   :  { %v3157_v38 = vpack.i.bf16 %v4305_v53, %v1332_v58  ;;  %v4312_v37 = vld [vmem:[#allocation2 + $0xd0] sm:$0xff]  ;;  %v3227_v58 = vpack.i.bf16 %v4238_v44, %v4236_v50  ;;  %v1418_v44 = vld [vmem:[#allocation2 + $0x120] sm:$0xff] }
 0x216   :  { %3073 = vrot.lane.b32.xlu0 %v3072_v2, %s3338_s0  ;;  %v1348_v2 = vld [vmem:[#allocation2 + $0xa2] sm:$0xff] }
 0x217   :  { %3078 = vrot.lane.b32.xlu1 %v3077_v63, %s3338_s0  ;;  %v3162_v63 = vpack.i.bf16 %v4312_v37, %v4310_v55 }
 0x218   :  { %2774 = vmatmul.mubr.msk.bf16.gmra.mrb[40].mxu0 %vm44_vm0, %v1949_v36  ;;  %v3167_v36 = vpack.i.bf16 %v1396_v59, %v1348_v2 }
 0x21a   :  { %3083 = vrot.lane.b32.xlu0 %v3082_v24, %s3340_s15 }
 0x21b   :  { %3088 = vrot.lane.b32.xlu1 %v3087_v46, %s3340_s15  ;;  %v4320_v46 = vld [vmem:[#allocation2 + $0xd1] sm:$0xff] }
 0x21e   :  { %3093 = vrot.lane.b32.xlu0 %v3092_v49, %s3339_s14  ;;  %v4323_v49 = vld [vmem:[#allocation2 + $0xb0] sm:$0xff] }
 0x21f   :  { %3098 = vrot.lane.b32.xlu1 %v3082_v24, %s3339_s14  ;;  %v4318_v24 = vld [vmem:[#allocation2 + $0xc1] sm:$0xff] }
 0x222   :  { %3103 = vrot.lane.b32.xlu0 %v3102_v41, %s3338_s0  ;;  %v3172_v41 = vpack.i.bf16 %v4320_v46, %v4318_v24 }
 0x223   :  { %3108 = vrot.lane.b32.xlu1 %v3107_v35, %s3338_s0  ;;  %v3177_v35 = vpack.i.bf16 %v4310_v55, %v4323_v49 }
 0x226   :  { %3113 = vrot.lane.b32.xlu0 %v3112_v48, %s3340_s15 }
 0x227   :  { %3118 = vrot.lane.b32.xlu1 %v3117_v57, %s3340_s15  ;;  %v4334_v57 = vld [vmem:[#allocation2 + $0xe0] sm:$0xff] }
 0x22a   :  { %3123 = vrot.lane.b32.xlu0 %v3122_v42, %s3339_s14  ;;  %v4336_v42 = vld [vmem:[#allocation2 + $0xf0] sm:$0xff] }
 0x22b   :  { %3128 = vrot.lane.b32.xlu1 %v3112_v48, %s3339_s14  ;;  %v3182_v48 = vpack.i.bf16 %v4236_v50, %v4213_v51  ;;  %v3192_v39 = vpack.i.bf16 %v4336_v42, %v4334_v57  ;;  %v4358_v51 = vld [vmem:[#allocation2 + $0x100] sm:$0xff] }
 0x22e   :  { %3133 = vrot.lane.b32.xlu0 %v3132_v28, %s3338_s0  ;;  %v4344_v28 = vld [vmem:[#allocation2 + $0xe1] sm:$0xff] }
 0x22f   :  { %3138 = vrot.lane.b32.xlu1 %v3137_v15, %s3338_s0  ;;  %v4346_v15 = vld [vmem:[#allocation2 + $0xf1] sm:$0xff] }
 0x230   :  { %v3202_v32 = vpack.i.bf16 %v4346_v15, %v4344_v28 }
 0x232   :  { %3143 = vrot.lane.b32.xlu0 %v3142_v56, %s3340_s15  ;;  %v3207_v56 = vpack.i.bf16 %v4334_v57, %v4312_v37 }
 0x233   :  { %3148 = vrot.lane.b32.xlu1 %v3147_v43, %s3340_s15  ;;  %v4360_v43 = vld [vmem:[#allocation2 + $0x110] sm:$0xff] }
 0x234   :  { %v3222_v59 = vpack.i.bf16 %v4360_v43, %v4358_v51 }
 0x236   :  { %3153 = vrot.lane.b32.xlu0 %v3152_v47, %s3339_s14  ;;  %v4368_v47 = vld [vmem:[#allocation2 + $0x101] sm:$0xff] }
 0x237   :  { %3158 = vrot.lane.b32.xlu1 %v3157_v38, %s3339_s14  ;;  %v4370_v38 = vld [vmem:[#allocation2 + $0x111] sm:$0xff] }
 0x238   :  { %v3232_v2 = vpack.i.bf16 %v4370_v38, %v4368_v47 }
 0x23a   :  { %3163 = vrot.lane.b32.xlu0 %v3162_v63, %s3338_s0  ;;  %v3237_v63 = vpack.i.bf16 %v4358_v51, %v4336_v42 }
 0x23b   :  { %3168 = vrot.lane.b32.xlu1 %v3167_v36, %s3338_s0  ;;  %v4378_v36 = vld [vmem:[#allocation2 + $0x122] sm:$0xff] }
 0x23c   :  { %v3242_v50 = vpack.i.bf16 %v4378_v36, %v4233_v16 }
 0x23e   :  { %3173 = vrot.lane.b32.xlu0 %v3172_v41, %s3340_s15 }
 0x23f   :  { %3178 = vrot.lane.b32.xlu1 %v3177_v35, %s3340_s15 }
 0x242   :  { %3183 = vrot.lane.b32.xlu0 %v3182_v48, %s3339_s14  ;;  %v3257_v48 = vpack.i.bf16 %v4233_v16, %v4227_v19 }
 0x243   :  { %3188 = vrot.lane.b32.xlu1 %v3172_v41, %s3339_s14  ;;  %v1419_v41 = vld [vmem:[#allocation2 + $0x130] sm:$0xff] }
 0x244   :  { %v3252_v35 = vpack.i.bf16 %v1419_v41, %v1418_v44 }
 0x246   :  { %3193 = vrot.lane.b32.xlu0 %v3192_v39, %s3338_s0  ;;  %v4388_v39 = vld [vmem:[#allocation2 + $0x121] sm:$0xff] }
 0x247   :  { %3198 = vrot.lane.b32.xlu1 %v3197_v54, %s3338_s0  ;;  %v1435_v54 = vld [vmem:[#allocation2 + $0x131] sm:$0xff] }
 0x24a   :  { %3203 = vrot.lane.b32.xlu0 %v3202_v32, %s3340_s15 }
 0x24b   :  { %3208 = vrot.lane.b32.xlu1 %v3207_v56, %s3340_s15  ;;  %v3267_v56 = vpack.i.bf16 %v1418_v44, %v4360_v43 }
 0x24e   :  { %3213 = vrot.lane.b32.xlu0 %v3212_v27, %s3339_s14 }
 0x24f   :  { %3218 = vrot.lane.b32.xlu1 %v3202_v32, %s3339_s14  ;;  %v3262_v32 = vpack.i.bf16 %v1435_v54, %v4388_v39 }
 0x252   :  { %3223 = vrot.lane.b32.xlu0 %v3222_v59, %s3338_s0 }
 0x253   :  { %3228 = vrot.lane.b32.xlu1 %v3227_v58, %s3338_s0 }
 0x256   :  { %3233 = vrot.lane.b32.xlu0 %v3232_v2, %s3340_s15 }
 0x257   :  { %3238 = vrot.lane.b32.xlu1 %v3237_v63, %s3340_s15 }
 0x25a   :  { %3243 = vrot.lane.b32.xlu0 %v3242_v50, %s3339_s14 }
 0x25b   :  { %3248 = vrot.lane.b32.xlu1 %v3232_v2, %s3339_s14 }
 0x25e   :  { %3253 = vrot.lane.b32.xlu0 %v3252_v35, %s3338_s0 }
 0x25f   :  { %3258 = vrot.lane.b32.xlu1 %v3257_v48, %s3338_s0 }
 0x262   :  { %3263 = vrot.lane.b32.xlu0 %v3262_v32, %s3340_s15 }
 0x263   :  { %3268 = vrot.lane.b32.xlu1 %v3267_v56, %s3340_s15 }
 0x278   :  { %v3034_v27 = vpop.permute.xlu0 %3033 }
 0x279   :  { %v3039_v59 = vpop.permute.xlu1 %3038  ;;  %v3036_v58 = vunpack.i.h.bf16 %v3034_v27  ;;  %v3035_v2 = vunpack.i.l.bf16 %v3034_v27 }
 0x27a   :  { %v3041_v50 = vunpack.i.h.bf16 %v3039_v59  ;;  %v3040_v41 = vunpack.i.l.bf16 %v3039_v59 }
 0x27b   :  { %v1885_v44 = vsel %vm44_vm0, %v4203_v20, %v3036_v58  ;;  %v1884_v54 = vsel %vm44_vm0, %v4177_v40, %v3035_v2 }
 0x27c   :  { %v3044_v63 = vpop.permute.xlu0 %3043  ;;  %v1836_v56 = vsel %vm44_vm0, %v1308_v13, %v3040_v41  ;;  %v1837_v27 = vsel %vm44_vm0, %v4208_v25, %v3041_v50 }
 0x27d   :  { %v3049_v17 = vpop.permute.xlu1 %3048  ;;  %v3046_v35 = vunpack.i.h.bf16 %v3044_v63  ;;  %v3045_v12 = vunpack.i.l.bf16 %v3044_v63 }
 0x27e   :  { %v3051_v48 = vunpack.i.h.bf16 %v3049_v17  ;;  %v3050_v11 = vunpack.i.l.bf16 %v3049_v17 }
 0x27f   :  { %v1900_v8 = vsel %vm650_vm3, %v1884_v54, %v3045_v12  ;;  %v1901_v63 = vsel %vm650_vm3, %v1885_v44, %v3046_v35 }
 0x280   :  { %v3054_v32 = vpop.permute.xlu0 %3053  ;;  %v1852_v20 = vsel %vm650_vm3, %v1836_v56, %v3050_v11  ;;  %v1853_v58 = vsel %vm650_vm3, %v1837_v27, %v3051_v48 }
 0x281   :  { %v3056_v10 = vunpack.i.h.bf16 %v3054_v32  ;;  %v3055_v59 = vunpack.i.l.bf16 %v3054_v32  ;;  %v3059_v9 = vpop.permute.xlu1 %3058 }
 0x282   :  { %v3061_v17 = vunpack.i.h.bf16 %v3059_v9  ;;  %v3060_v7 = vunpack.i.l.bf16 %v3059_v9 }
 0x283   :  { %v1916_v40 = vsel %vm667_vm4, %v1900_v8, %v3055_v59  ;;  %v1917_v13 = vsel %vm667_vm4, %v1901_v63, %v3056_v10 }
 0x284   :  { %v1868_v2 = vsel %vm667_vm4, %v1852_v20, %v3060_v7  ;;  %v1869_v25 = vsel %vm667_vm4, %v1853_v58, %v3061_v17  ;;  %v3064_v50 = vpop.permute.xlu0 %3063  ;;  %v1933_v41 = vpack.c.bf16 %v1917_v13, %v1916_v40 }
 0x285   :  { %v1932_v32 = vpack.c.bf16 %v1869_v25, %v1868_v2  ;;  %v3069_v12 = vpop.permute.xlu1 %3068  ;;  %v3066_v35 = vunpack.i.h.bf16 %v3064_v50  ;;  %v3065_v9 = vunpack.i.l.bf16 %v3064_v50 }
 0x286   :  { %2156 = vmatprep.mubr.bf16.mxu1 %v1933_v41  ;;  %v3071_v11 = vunpack.i.h.bf16 %v3069_v12  ;;  %v3070_v48 = vunpack.i.l.bf16 %v3069_v12 }
 0x287   :  { %2157 = vmatmul.mubr.bf16.vlgmr.msra.gmra.mrb[16].mxu1 %v1932_v32  ;;  %v1887_v27 = vsel %vm44_vm0, %v4255_v26, %v3066_v35  ;;  %v1886_v59 = vsel %vm44_vm0, %v4205_v21, %v3065_v9 }
 0x288   :  { %v3074_v44 = vpop.permute.xlu0 %3073  ;;  %2783 = vmatpush3.bf16.msra.mxu1 %v3920_v23  ;;  %v1839_v23 = vsel %vm44_vm0, %v4196_v33, %v3071_v11  ;;  %v1838_v17 = vsel %vm44_vm0, %v4190_v22, %v3070_v48 }
 0x289   :  { %v3079_v8 = vpop.permute.xlu1 %3078  ;;  %2782 = vmatprep.subr.bf16.mxu1 %v3925_v45  ;;  %v3076_v10 = vunpack.i.h.bf16 %v3074_v44  ;;  %v3075_v7 = vunpack.i.l.bf16 %v3074_v44 }
 0x28a   :  { %v3081_v54 = vunpack.i.h.bf16 %v3079_v8  ;;  %v3080_v56 = vunpack.i.l.bf16 %v3079_v8 }
 0x28b   :  { %v1902_v13 = vsel %vm650_vm3, %v1886_v59, %v3075_v7  ;;  %v1903_v2 = vsel %vm650_vm3, %v1887_v27, %v3076_v10 }
 0x28c   :  { %v3084_v63 = vpop.permute.xlu0 %3083  ;;  %2784 = vmatpush3.bf16.msra.mxu1 %v3925_v45  ;;  %v1854_v21 = vsel %vm650_vm3, %v1838_v17, %v3080_v56  ;;  %v1855_v50 = vsel %vm650_vm3, %v1839_v23, %v3081_v54 }
 0x28d   :  { %v3086_v20 = vunpack.i.h.bf16 %v3084_v63  ;;  %v3085_v58 = vunpack.i.l.bf16 %v3084_v63  ;;  %v3089_v40 = vpop.permute.xlu1 %3088 }
 0x28e   :  { %v3091_v26 = vunpack.i.h.bf16 %v3089_v40  ;;  %v3090_v25 = vunpack.i.l.bf16 %v3089_v40 }
 0x28f   :  { %v1918_v45 = vsel %vm667_vm4, %v1902_v13, %v3085_v58  ;;  %v1919_v33 = vsel %vm667_vm4, %v1903_v2, %v3086_v20 }
 0x290   :  { %v3094_v41 = vpop.permute.xlu0 %3093  ;;  %v1936_v32 = vpack.c.bf16 %v1919_v33, %v1918_v45  ;;  %v1870_v22 = vsel %vm667_vm4, %v1854_v21, %v3090_v25  ;;  %v1871_v12 = vsel %vm667_vm4, %v1855_v50, %v3091_v26 }
 0x291   :  { %v3099_v35 = vpop.permute.xlu1 %3098  ;;  %v1935_v9 = vpack.c.bf16 %v1871_v12, %v1870_v22  ;;  %v3096_v44 = vunpack.i.h.bf16 %v3094_v41  ;;  %v3095_v11 = vunpack.i.l.bf16 %v3094_v41 }
 0x292   :  { %2164 = vmatprep.mubr.bf16.mxu1 %v1936_v32  ;;  %v3101_v8 = vunpack.i.h.bf16 %v3099_v35  ;;  %v3100_v10 = vunpack.i.l.bf16 %v3099_v35 }
 0x293   :  { %2165 = vmatmul.mubr.bf16.gmra.mrb[20].mxu1 %v1935_v9  ;;  %v1889_v63 = vsel %vm44_vm0, %v4281_v18, %v3096_v44  ;;  %v1888_v23 = vsel %vm44_vm0, %v4257_v34, %v3095_v11 }
 0x294   :  { %v3104_v48 = vpop.permute.xlu0 %3103  ;;  %v1841_v20 = vsel %vm44_vm0, %v4231_v29, %v3101_v8  ;;  %v1840_v58 = vsel %vm44_vm0, %v4229_v30, %v3100_v10 }
 0x295   :  { %v3109_v7 = vpop.permute.xlu1 %3108  ;;  %v3106_v54 = vunpack.i.h.bf16 %v3104_v48  ;;  %v3105_v56 = vunpack.i.l.bf16 %v3104_v48 }
 0x296   :  { %v3111_v27 = vunpack.i.h.bf16 %v3109_v7  ;;  %v3110_v59 = vunpack.i.l.bf16 %v3109_v7 }
 0x297   :  { %v1904_v26 = vsel %vm650_vm3, %v1888_v23, %v3105_v56  ;;  %v1905_v25 = vsel %vm650_vm3, %v1889_v63, %v3106_v54 }
 0x298   :  { %v3114_v17 = vpop.permute.xlu0 %3113  ;;  %v1856_v18 = vsel %vm650_vm3, %v1840_v58, %v3110_v59  ;;  %v1857_v34 = vsel %vm650_vm3, %v1841_v20, %v3111_v27 }
 0x299   :  { %v3116_v40 = vunpack.i.h.bf16 %v3114_v17  ;;  %v3115_v13 = vunpack.i.l.bf16 %v3114_v17  ;;  %v3119_v2 = vpop.permute.xlu1 %3118 }
 0x29a   :  { %v3121_v21 = vunpack.i.h.bf16 %v3119_v2  ;;  %v3120_v50 = vunpack.i.l.bf16 %v3119_v2 }
 0x29b   :  { %v1920_v45 = vsel %vm667_vm4, %v1904_v26, %v3115_v13  ;;  %v1921_v29 = vsel %vm667_vm4, %v1905_v25, %v3116_v40 }
 0x29c   :  { %v3124_v33 = vpop.permute.xlu0 %3123  ;;  %v1939_v41 = vpack.c.bf16 %v1921_v29, %v1920_v45  ;;  %v1872_v30 = vsel %vm667_vm4, %v1856_v18, %v3120_v50  ;;  %v1873_v32 = vsel %vm667_vm4, %v1857_v34, %v3121_v21 }
 0x29d   :  { %v3129_v22 = vpop.permute.xlu1 %3128  ;;  %v1938_v12 = vpack.c.bf16 %v1873_v32, %v1872_v30  ;;  %v3126_v35 = vunpack.i.h.bf16 %v3124_v33  ;;  %v3125_v9 = vunpack.i.l.bf16 %v3124_v33 }
 0x29e   :  { %2172 = vmatprep.mubr.bf16.mxu1 %v1939_v41  ;;  %v3131_v11 = vunpack.i.h.bf16 %v3129_v22  ;;  %v3130_v48 = vunpack.i.l.bf16 %v3129_v22 }
 0x29f   :  { %2173 = vmatmul.mubr.bf16.gmra.mrb[24].mxu1 %v1938_v12  ;;  %v1891_v27 = vsel %vm44_vm0, %v4298_v31, %v3126_v35  ;;  %v1890_v59 = vsel %vm44_vm0, %v4283_v61, %v3125_v9  ;;  %v1316_v35 = vld [vmem:[#allocation2 + $0xa0] sm:$0xff] }
 0x2a0   :  { %v3134_v44 = vpop.permute.xlu0 %3133  ;;  %v1843_v23 = vsel %vm44_vm0, %v4273_v52, %v3131_v11  ;;  %v1842_v17 = vsel %vm44_vm0, %v4271_v60, %v3130_v48 }
 0x2a1   :  { %v3139_v8 = vpop.permute.xlu1 %3138  ;;  %v3136_v10 = vunpack.i.h.bf16 %v3134_v44  ;;  %v3135_v7 = vunpack.i.l.bf16 %v3134_v44 }
 0x2a2   :  { %v3141_v54 = vunpack.i.h.bf16 %v3139_v8  ;;  %v3140_v56 = vunpack.i.l.bf16 %v3139_v8 }
 0x2a3   :  { %v1906_v13 = vsel %vm650_vm3, %v1890_v59, %v3135_v7  ;;  %v1907_v2 = vsel %vm650_vm3, %v1891_v27, %v3136_v10 }
 0x2a4   :  { %v3144_v63 = vpop.permute.xlu0 %3143  ;;  %v1858_v31 = vsel %vm650_vm3, %v1842_v17, %v3140_v56  ;;  %v1859_v61 = vsel %vm650_vm3, %v1843_v23, %v3141_v54 }
 0x2a5   :  { %v3146_v20 = vunpack.i.h.bf16 %v3144_v63  ;;  %v3145_v58 = vunpack.i.l.bf16 %v3144_v63  ;;  %v3149_v40 = vpop.permute.xlu1 %3148 }
 0x2a6   :  { %v3151_v26 = vunpack.i.h.bf16 %v3149_v40  ;;  %v3150_v25 = vunpack.i.l.bf16 %v3149_v40 }
 0x2a7   :  { %v1922_v21 = vsel %vm667_vm4, %v1906_v13, %v3145_v58  ;;  %v1923_v52 = vsel %vm667_vm4, %v1907_v2, %v3146_v20 }
 0x2a8   :  { %v3154_v50 = vpop.permute.xlu0 %3153  ;;  %v1942_v18 = vpack.c.bf16 %v1923_v52, %v1922_v21  ;;  %v1874_v60 = vsel %vm667_vm4, %v1858_v31, %v3150_v25  ;;  %v1875_v34 = vsel %vm667_vm4, %v1859_v61, %v3151_v26 }
 0x2a9   :  { %v3159_v45 = vpop.permute.xlu1 %3158  ;;  %v1941_v29 = vpack.c.bf16 %v1875_v34, %v1874_v60  ;;  %v3156_v33 = vunpack.i.h.bf16 %v3154_v50  ;;  %v3155_v41 = vunpack.i.l.bf16 %v3154_v50 }
 0x2aa   :  { %2180 = vmatprep.mubr.bf16.mxu1 %v1942_v18  ;;  %v3161_v32 = vunpack.i.h.bf16 %v3159_v45  ;;  %v3160_v22 = vunpack.i.l.bf16 %v3159_v45 }
 0x2ab   :  { %2181 = vmatmul.mubr.bf16.gmra.mrb[28].mxu1 %v1941_v29  ;;  %v1893_v8 = vsel %vm44_vm0, %v4318_v24, %v3156_v33  ;;  %v1892_v10 = vsel %vm44_vm0, %v4305_v53, %v3155_v41 }
 0x2ac   :  { %v3164_v30 = vpop.permute.xlu0 %3163  ;;  %v1845_v54 = vsel %vm44_vm0, %v4323_v49, %v3161_v32  ;;  %v1844_v56 = vsel %vm44_vm0, %v1316_v35, %v3160_v22 }
 0x2ad   :  { %v3169_v12 = vpop.permute.xlu1 %3168  ;;  %v3166_v9 = vunpack.i.h.bf16 %v3164_v30  ;;  %v3165_v44 = vunpack.i.l.bf16 %v3164_v30 }
 0x2ae   :  { %v3171_v11 = vunpack.i.h.bf16 %v3169_v12  ;;  %v3170_v48 = vunpack.i.l.bf16 %v3169_v12 }
 0x2af   :  { %v1908_v23 = vsel %vm650_vm3, %v1892_v10, %v3165_v44  ;;  %v1909_v17 = vsel %vm650_vm3, %v1893_v8, %v3166_v9 }
 0x2b0   :  { %v3174_v7 = vpop.permute.xlu0 %3173  ;;  %v1860_v24 = vsel %vm650_vm3, %v1844_v56, %v3170_v48  ;;  %v1861_v40 = vsel %vm650_vm3, %v1845_v54, %v3171_v11 }
 0x2b1   :  { %v3176_v27 = vunpack.i.h.bf16 %v3174_v7  ;;  %v3175_v59 = vunpack.i.l.bf16 %v3174_v7  ;;  %v3179_v63 = vpop.permute.xlu1 %3178 }
 0x2b2   :  { %v3181_v20 = vunpack.i.h.bf16 %v3179_v63  ;;  %v3180_v58 = vunpack.i.l.bf16 %v3179_v63 }
 0x2b3   :  { %v1924_v53 = vsel %vm667_vm4, %v1908_v23, %v3175_v59  ;;  %v1925_v13 = vsel %vm667_vm4, %v1909_v17, %v3176_v27 }
 0x2b4   :  { %v3184_v49 = vpop.permute.xlu0 %3183  ;;  %v1945_v2 = vpack.c.bf16 %v1925_v13, %v1924_v53  ;;  %v1876_v26 = vsel %vm667_vm4, %v1860_v24, %v3180_v58  ;;  %v1877_v25 = vsel %vm667_vm4, %v1861_v40, %v3181_v20 }
 0x2b5   :  { %v3189_v31 = vpop.permute.xlu1 %3188  ;;  %v1944_v61 = vpack.c.bf16 %v1877_v25, %v1876_v26  ;;  %v3186_v21 = vunpack.i.h.bf16 %v3184_v49  ;;  %v3185_v52 = vunpack.i.l.bf16 %v3184_v49 }
 0x2b6   :  { %2188 = vmatprep.mubr.bf16.mxu1 %v1945_v2  ;;  %v3191_v18 = vunpack.i.h.bf16 %v3189_v31  ;;  %v3190_v60 = vunpack.i.l.bf16 %v3189_v31 }
 0x2b7   :  { %2189 = vmatmul.mubr.bf16.gmra.mrb[32].mxu1 %v1944_v61  ;;  %v1895_v30 = vsel %vm44_vm0, %v4344_v28, %v3186_v21  ;;  %v1894_v32 = vsel %vm44_vm0, %v4320_v46, %v3185_v52 }
 0x2b8   :  { %v3194_v50 = vpop.permute.xlu0 %3193  ;;  %v1847_v12 = vsel %vm44_vm0, %v4312_v37, %v3191_v18  ;;  %v1846_v35 = vsel %vm44_vm0, %v4310_v55, %v3190_v60 }
 0x2b9   :  { %v3199_v34 = vpop.permute.xlu1 %3198  ;;  %v3196_v45 = vunpack.i.h.bf16 %v3194_v50  ;;  %v3195_v29 = vunpack.i.l.bf16 %v3194_v50 }
 0x2ba   :  { %v3201_v33 = vunpack.i.h.bf16 %v3199_v34  ;;  %v3200_v41 = vunpack.i.l.bf16 %v3199_v34 }
 0x2bb   :  { %v1910_v48 = vsel %vm650_vm3, %v1894_v32, %v3195_v29  ;;  %v1911_v8 = vsel %vm650_vm3, %v1895_v30, %v3196_v45 }
 0x2bc   :  { %v3204_v22 = vpop.permute.xlu0 %3203  ;;  %v1862_v28 = vsel %vm650_vm3, %v1846_v35, %v3200_v41  ;;  %v1863_v46 = vsel %vm650_vm3, %v1847_v12, %v3201_v33 }
 0x2bd   :  { %v3206_v9 = vunpack.i.h.bf16 %v3204_v22  ;;  %v3205_v44 = vunpack.i.l.bf16 %v3204_v22  ;;  %v3209_v11 = vpop.permute.xlu1 %3208 }
 0x2be   :  { %v3211_v10 = vunpack.i.h.bf16 %v3209_v11  ;;  %v3210_v7 = vunpack.i.l.bf16 %v3209_v11 }
 0x2bf   :  { %v1926_v54 = vsel %vm667_vm4, %v1910_v48, %v3205_v44  ;;  %v1927_v37 = vsel %vm667_vm4, %v1911_v8, %v3206_v9 }
 0x2c0   :  { %v3214_v56 = vpop.permute.xlu0 %3213  ;;  %v1948_v27 = vpack.c.bf16 %v1927_v37, %v1926_v54  ;;  %v1878_v55 = vsel %vm667_vm4, %v1862_v28, %v3210_v7  ;;  %v1879_v59 = vsel %vm667_vm4, %v1863_v46, %v3211_v10 }
 0x2c1   :  { %v3219_v63 = vpop.permute.xlu1 %3218  ;;  %v1947_v23 = vpack.c.bf16 %v1879_v59, %v1878_v55  ;;  %v3216_v17 = vunpack.i.h.bf16 %v3214_v56  ;;  %v3215_v20 = vunpack.i.l.bf16 %v3214_v56 }
 0x2c2   :  { %2196 = vmatprep.mubr.bf16.mxu1 %v1948_v27  ;;  %v3221_v24 = vunpack.i.h.bf16 %v3219_v63  ;;  %v3220_v40 = vunpack.i.l.bf16 %v3219_v63 }
 0x2c3   :  { %2197 = vmatmul.mubr.bf16.gmra.mrb[36].mxu1 %v1947_v23  ;;  %v1897_v25 = vsel %vm44_vm0, %v4368_v47, %v3216_v17  ;;  %v1896_v31 = vsel %vm44_vm0, %v4346_v15, %v3215_v20 }
 0x2c4   :  { %v3224_v58 = vpop.permute.xlu0 %3223  ;;  %v1849_v21 = vsel %vm44_vm0, %v4336_v42, %v3221_v24  ;;  %v1848_v52 = vsel %vm44_vm0, %v4334_v57, %v3220_v40 }
 0x2c5   :  { %v3229_v53 = vpop.permute.xlu1 %3228  ;;  %v3226_v13 = vunpack.i.h.bf16 %v3224_v58  ;;  %v3225_v49 = vunpack.i.l.bf16 %v3224_v58 }
 0x2c6   :  { %v3231_v2 = vunpack.i.h.bf16 %v3229_v53  ;;  %v3230_v26 = vunpack.i.l.bf16 %v3229_v53 }
 0x2c7   :  { %v1912_v34 = vsel %vm650_vm3, %v1896_v31, %v3225_v49  ;;  %v1913_v45 = vsel %vm650_vm3, %v1897_v25, %v3226_v13 }
 0x2c8   :  { %v3234_v61 = vpop.permute.xlu0 %3233  ;;  %v1864_v47 = vsel %vm650_vm3, %v1848_v52, %v3230_v26  ;;  %v1865_v15 = vsel %vm650_vm3, %v1849_v21, %v3231_v2  ;;  %v1451_v52 = vld [vmem:[#allocation2 + $0x132] sm:$0xff] }
 0x2c9   :  { %v3236_v50 = vunpack.i.h.bf16 %v3234_v61  ;;  %v3235_v18 = vunpack.i.l.bf16 %v3234_v61  ;;  %v3239_v60 = vpop.permute.xlu1 %3238  ;;  %v4750_v61 = vpack.c.bf16 %v4233_v16, %v4227_v19 }
 0x2ca   :  { %v3241_v29 = vunpack.i.h.bf16 %v3239_v60  ;;  %v3240_v33 = vunpack.i.l.bf16 %v3239_v60 }
 0x2cb   :  { %v1928_v41 = vsel %vm667_vm4, %v1912_v34, %v3235_v18  ;;  %v1929_v42 = vsel %vm667_vm4, %v1913_v45, %v3236_v50  ;;  %v1955_v50 = vpack.c.bf16 %v1451_v52, %v4378_v36 }
 0x2cc   :  { %v3244_v30 = vpop.permute.xlu0 %3243  ;;  %v1951_v32 = vpack.c.bf16 %v1929_v42, %v1928_v41  ;;  %v1880_v57 = vsel %vm667_vm4, %v1864_v47, %v3240_v33  ;;  %v1881_v22 = vsel %vm667_vm4, %v1865_v15, %v3241_v29 }
 0x2cd   :  { %v3249_v12 = vpop.permute.xlu1 %3248  ;;  %v1950_v35 = vpack.c.bf16 %v1881_v22, %v1880_v57  ;;  %v3246_v9 = vunpack.i.h.bf16 %v3244_v30  ;;  %v3245_v44 = vunpack.i.l.bf16 %v3244_v30 }
 0x2ce   :  { %2204 = vmatprep.mubr.bf16.mxu1 %v1951_v32  ;;  %v3251_v48 = vunpack.i.h.bf16 %v3249_v12  ;;  %v3250_v8 = vunpack.i.l.bf16 %v3249_v12 }
 0x2cf   :  { %2205 = vmatmul.mubr.bf16.gmra.mrb[40].mxu1 %v1950_v35  ;;  %v1899_v37 = vsel %vm44_vm0, %v4388_v39, %v3246_v9  ;;  %v1898_v56 = vsel %vm44_vm0, %v4370_v38, %v3245_v44 }
 0x2d0   :  { %v3254_v11 = vpop.permute.xlu0 %3253  ;;  %v1851_v55 = vsel %vm44_vm0, %v4360_v43, %v3251_v48  ;;  %v1850_v59 = vsel %vm44_vm0, %v4358_v51, %v3250_v8 }
 0x2d1   :  { %v3259_v10 = vpop.permute.xlu1 %3258  ;;  %v3256_v7 = vunpack.i.h.bf16 %v3254_v11  ;;  %v3255_v28 = vunpack.i.l.bf16 %v3254_v11 }
 0x2d2   :  { %v3261_v46 = vunpack.i.h.bf16 %v3259_v10  ;;  %v3260_v54 = vunpack.i.l.bf16 %v3259_v10 }
 0x2d3   :  { %v1914_v20 = vsel %vm650_vm3, %v1898_v56, %v3255_v28  ;;  %v1915_v58 = vsel %vm650_vm3, %v1899_v37, %v3256_v7 }
 0x2d4   :  { %v3264_v27 = vpop.permute.xlu0 %3263  ;;  %v1866_v39 = vsel %vm650_vm3, %v1850_v59, %v3260_v54  ;;  %v1867_v38 = vsel %vm650_vm3, %v1851_v55, %v3261_v46 }
 0x2d5   :  { %v3266_v63 = vunpack.i.h.bf16 %v3264_v27  ;;  %v3265_v23 = vunpack.i.l.bf16 %v3264_v27  ;;  %v3269_v17 = vpop.permute.xlu1 %3268 }
 0x2d6   :  { %v3271_v24 = vunpack.i.h.bf16 %v3269_v17  ;;  %v3270_v40 = vunpack.i.l.bf16 %v3269_v17 }
 0x2d7   :  { %v1930_v53 = vsel %vm667_vm4, %v1914_v20, %v3265_v23  ;;  %v1931_v43 = vsel %vm667_vm4, %v1915_v58, %v3266_v63 }
 0x2d8   :  { %v1954_v13 = vpack.c.bf16 %v1931_v43, %v1930_v53  ;;  %v1882_v51 = vsel %vm667_vm4, %v1866_v39, %v3270_v40  ;;  %v1883_v49 = vsel %vm667_vm4, %v1867_v38, %v3271_v24 }
 0x2d9   :  { %v1953_v2 = vpack.c.bf16 %v1883_v49, %v1882_v51 }
 0x2da   :  { %2212 = vmatprep.mubr.bf16.mxu1 %v1954_v13 }
 0x2db   :  { %v2767_v26 = vpop.f32.mrb[32].mxu0  ;;  %2213 = vmatmul.mubr.bf16.gmra.mrb[44].mxu1 %v1953_v2 }
 0x2dc   :  { %v2255_v25 = vpop.f32.mrb[33].mxu0  ;;  %2777 = vmatprep.mubr.msk.bf16.mxu1 %vm44_vm0, %v4750_v61 }
 0x2dd   :  { %v2768_v31 = vpop.f32.mrb[34].mxu0 }
 0x2de   :  { %v2258_v21 = vpop.f32.mrb[35].mxu0 }
 0x2e3   :  { %v4530_v18 = vpop.f32.mrb[36].mxu0  ;;  %2778 = vmatmul.mubr.msk.bf16.vlgmr.msra.gmra.mrb[48].mxu1 %vm44_vm0, %v1955_v50 }
 0x2e4   :  { %v2271_v60 = vpop.f32.mrb[37].mxu0 }
 0x2e5   :  { %v4533_v34 = vpop.f32.mrb[38].mxu0 }
 0x2e6   :  { %v2274_v45 = vpop.f32.mrb[39].mxu0 }
 0x2eb   :  { %v4535_v29 = vpop.f32.mrb[40].mxu0 }
 0x2ec   :  { %v4537_v33 = vpop.f32.mrb[41].mxu0 }
 0x2ed   :  { %v4539_v47 = vpop.f32.mrb[42].mxu0 }
 0x2ee   :  { %v4541_v19 = vpop.f32.mrb[43].mxu0 }
 0x35a   :  { %v2683_v16 = vpop.f32.mrb[16].mxu1 }
 0x35b   :  { %v2684_v15 = vpop.f32.mrb[17].mxu1 }
 0x35c   :  { %v2685_v41 = vadd.f32 %v2684_v15, %v2683_v16  ;;  %v2686_v36 = vpop.f32.mrb[18].mxu1 }
 0x35d   :  { %v2687_v42 = vpop.f32.mrb[19].mxu1 }
 0x35e   :  { %v4543_v30 = vadd.f32 %v2685_v41, %v2255_v25  ;;  %v2688_v32 = vadd.f32 %v2687_v42, %v2686_v36 }
 0x360   :  { %v4545_v57 = vadd.f32 %v2688_v32, %v2258_v21  ;;  %v2356_v46 = vmul.f32 %v4543_v30, %v4543_v30  ;;  %v2318_v55 = vsel %vm44_vm0, %v4543_v30, 0.0 }
 0x362   :  { %v2357_v10 = vmul.f32 %v4545_v57, %v4545_v57  ;;  %v2319_v54 = vsel %vm44_vm0, %v4545_v57, 0.0  ;;  %v2372_v24 = vsel %vm44_vm0, %v2356_v46, 0.0 }
 0x363   :  { %v2320_v58 = vadd.f32 %v2319_v54, %v2318_v55 }
 0x364   :  { %v2373_v63 = vsel %vm44_vm0, %v2357_v10, 0.0 }
 0x365   :  { %v2374_v53 = vadd.f32 %v2373_v63, %v2372_v24 }
 0x366   :  { %v2689_v22 = vpop.f32.mrb[20].mxu1 }
 0x367   :  { %v2690_v12 = vpop.f32.mrb[21].mxu1 }
 0x368   :  { %v2691_v35 = vadd.f32 %v2690_v12, %v2689_v22  ;;  %v2692_v9 = vpop.f32.mrb[22].mxu1 }
 0x369   :  { %v2693_v44 = vpop.f32.mrb[23].mxu1 }
 0x36a   :  { %v4547_v11 = vadd.f32 %v2767_v26, %v2691_v35  ;;  %v2694_v48 = vadd.f32 %v2693_v44, %v2692_v9 }
 0x36c   :  { %v4549_v8 = vadd.f32 %v2768_v31, %v2694_v48  ;;  %v2358_v37 = vmul.f32 %v4547_v11, %v4547_v11  ;;  %v2321_v23 = vsel %vm44_vm0, %v4547_v11, 0.0 }
 0x36d   :  { %v2322_v43 = vadd.f32 %v2321_v23, %v2320_v58 }
 0x36e   :  { %v2375_v40 = vsel %vm44_vm0, %v2358_v37, 0.0  ;;  %v2359_v39 = vmul.f32 %v4549_v8, %v4549_v8  ;;  %v2323_v13 = vsel %vm44_vm0, %v4549_v8, 0.0 }
 0x36f   :  { %v2376_v49 = vadd.f32 %v2375_v40, %v2374_v53  ;;  %v2324_v25 = vadd.f32 %v2323_v13, %v2322_v43 }
 0x370   :  { %v2377_v2 = vsel %vm44_vm0, %v2359_v39, 0.0 }
 0x371   :  { %v2378_v52 = vadd.f32 %v2377_v2, %v2376_v49 }
 0x372   :  { %v2695_v7 = vpop.f32.mrb[24].mxu1 }
 0x373   :  { %v2696_v28 = vpop.f32.mrb[25].mxu1 }
 0x374   :  { %v2697_v56 = vadd.f32 %v2696_v28, %v2695_v7  ;;  %v2698_v27 = vpop.f32.mrb[26].mxu1 }
 0x375   :  { %v2699_v59 = vpop.f32.mrb[27].mxu1 }
 0x376   :  { %v4564_v17 = vadd.f32 %v2697_v56, %v2271_v60  ;;  %v2700_v20 = vadd.f32 %v2699_v59, %v2698_v27 }
 0x378   :  { %v4570_v38 = vadd.f32 %v2700_v20, %v2274_v45  ;;  %v2360_v51 = vmul.f32 %v4564_v17, %v4564_v17  ;;  %v2325_v26 = vsel %vm44_vm0, %v4564_v17, 0.0 }
 0x379   :  { %v2326_v50 = vadd.f32 %v2325_v26, %v2324_v25 }
 0x37a   :  { %v2379_v31 = vsel %vm44_vm0, %v2360_v51, 0.0  ;;  %v2361_v61 = vmul.f32 %v4570_v38, %v4570_v38  ;;  %v2327_v45 = vsel %vm44_vm0, %v4570_v38, 0.0 }
 0x37b   :  { %v2380_v41 = vadd.f32 %v2379_v31, %v2378_v52  ;;  %v2328_v12 = vadd.f32 %v2327_v45, %v2326_v50 }
 0x37c   :  { %v2381_v42 = vsel %vm44_vm0, %v2361_v61, 0.0 }
 0x37d   :  { %v2382_v48 = vadd.f32 %v2381_v42, %v2380_v41 }
 0x37e   :  { %v2701_v21 = vpop.f32.mrb[28].mxu1 }
 0x37f   :  { %v2702_v60 = vpop.f32.mrb[29].mxu1 }
 0x380   :  { %v2703_v16 = vadd.f32 %v2702_v60, %v2701_v21  ;;  %v2704_v15 = vpop.f32.mrb[30].mxu1 }
 0x381   :  { %v2705_v36 = vpop.f32.mrb[31].mxu1 }
 0x382   :  { %v4586_v32 = vadd.f32 %v4530_v18, %v2703_v16  ;;  %v2706_v22 = vadd.f32 %v2705_v36, %v2704_v15 }
 0x384   :  { %v2329_v35 = vsel %vm44_vm0, %v4586_v32, 0.0  ;;  %v2362_v9 = vmul.f32 %v4586_v32, %v4586_v32  ;;  %v4593_v44 = vadd.f32 %v4533_v34, %v2706_v22 }
 0x385   :  { %v2330_v10 = vadd.f32 %v2329_v35, %v2328_v12 }
 0x386   :  { %v2383_v7 = vsel %vm44_vm0, %v2362_v9, 0.0  ;;  %v2331_v28 = vsel %vm44_vm0, %v4593_v44, 0.0  ;;  %v2363_v18 = vmul.f32 %v4593_v44, %v4593_v44 }
 0x387   :  { %v2384_v46 = vadd.f32 %v2383_v7, %v2382_v48  ;;  %v2332_v54 = vadd.f32 %v2331_v28, %v2330_v10 }
 0x388   :  { %v2385_v37 = vsel %vm44_vm0, %v2363_v18, 0.0 }
 0x389   :  { %v2386_v56 = vadd.f32 %v2385_v37, %v2384_v46 }
 0x38a   :  { %v2707_v27 = vpop.f32.mrb[32].mxu1 }
 0x38b   :  { %v2708_v55 = vpop.f32.mrb[33].mxu1 }
 0x38c   :  { %v2709_v59 = vadd.f32 %v2708_v55, %v2707_v27  ;;  %v2710_v34 = vpop.f32.mrb[34].mxu1 }
 0x38d   :  { %v2711_v63 = vpop.f32.mrb[35].mxu1 }
 0x38e   :  { %v4602_v23 = vadd.f32 %v2709_v59, %v4537_v33  ;;  %v2712_v20 = vadd.f32 %v2711_v63, %v2710_v34 }
 0x390   :  { %v2333_v58 = vsel %vm44_vm0, %v4602_v23, 0.0  ;;  %v2364_v24 = vmul.f32 %v4602_v23, %v4602_v23  ;;  %v4609_v40 = vadd.f32 %v2712_v20, %v4541_v19 }
 0x391   :  { %v2334_v39 = vadd.f32 %v2333_v58, %v2332_v54 }
 0x392   :  { %v2387_v53 = vsel %vm44_vm0, %v2364_v24, 0.0  ;;  %v2335_v43 = vsel %vm44_vm0, %v4609_v40, 0.0  ;;  %v2365_v33 = vmul.f32 %v4609_v40, %v4609_v40 }
 0x393   :  { %v2388_v13 = vadd.f32 %v2387_v53, %v2386_v56  ;;  %v2336_v51 = vadd.f32 %v2335_v43, %v2334_v39 }
 0x394   :  { %v2389_v49 = vsel %vm44_vm0, %v2365_v33, 0.0 }
 0x395   :  { %v2390_v2 = vadd.f32 %v2389_v49, %v2388_v13 }
 0x396   :  { %v2713_v26 = vpop.f32.mrb[36].mxu1 }
 0x397   :  { %v2714_v25 = vpop.f32.mrb[37].mxu1 }
 0x398   :  { %v2715_v31 = vadd.f32 %v2714_v25, %v2713_v26  ;;  %v2716_v61 = vpop.f32.mrb[38].mxu1 }
 0x399   :  { %v2717_v19 = vpop.f32.mrb[39].mxu1 }
 0x39a   :  { %v4618_v21 = vadd.f32 %v4535_v29, %v2715_v31  ;;  %v2718_v52 = vadd.f32 %v2717_v19, %v2716_v61 }
 0x39c   :  { %v2337_v50 = vsel %vm44_vm0, %v4618_v21, 0.0  ;;  %v2366_v60 = vmul.f32 %v4618_v21, %v4618_v21  ;;  %v4625_v45 = vadd.f32 %v4539_v47, %v2718_v52 }
 0x39d   :  { %v2338_v16 = vadd.f32 %v2337_v50, %v2336_v51 }
 0x39e   :  { %v2391_v15 = vsel %vm44_vm0, %v2366_v60, 0.0  ;;  %v2339_v41 = vsel %vm44_vm0, %v4625_v45, 0.0  ;;  %v2367_v29 = vmul.f32 %v4625_v45, %v4625_v45 }
 0x39f   :  { %v2392_v36 = vadd.f32 %v2391_v15, %v2390_v2  ;;  %v2340_v42 = vadd.f32 %v2339_v41, %v2338_v16 }
 0x3a0   :  { %v2393_v22 = vsel %vm44_vm0, %v2367_v29, 0.0 }
 0x3a1   :  { %v2394_v12 = vadd.f32 %v2393_v22, %v2392_v36 }
 0x3a2   :  { %v2719_v35 = vpop.f32.mrb[40].mxu1 }
 0x3a3   :  { %v2720_v9 = vpop.f32.mrb[41].mxu1 }
 0x3a4   :  { %v2721_v48 = vadd.f32 %v2720_v9, %v2719_v35  ;;  %v2722_v10 = vpop.f32.mrb[42].mxu1 }
 0x3a5   :  { %v2723_v47 = vpop.f32.mrb[43].mxu1 }
 0x3a6   :  { %v2724_v7 = vadd.f32 %v2723_v47, %v2722_v10 }
 0x3ae   :  { %v2725_v28 = vpop.f32.mrb[44].mxu1 }
 0x3af   :  { %v2726_v18 = vpop.f32.mrb[45].mxu1 }
 0x3b0   :  { %v2727_v46 = vadd.f32 %v2726_v18, %v2725_v28  ;;  %v2728_v54 = vpop.f32.mrb[46].mxu1 }
 0x3b1   :  { %v2729_v37 = vpop.f32.mrb[47].mxu1 }
 0x3b2   :  { %v2730_v56 = vadd.f32 %v2729_v37, %v2728_v54 }
 0x3b6   :  { %v2779_v27 = vpop.f32.mrb[48].mxu1 }
 0x3b7   :  { %v4633_v55 = vadd.f32 %v2779_v27, %v2727_v46  ;;  %v2303_v59 = vpop.f32.mrb[49].mxu1 }
 0x3b8   :  { %v4635_v34 = vadd.f32 %v2721_v48, %v2303_v59  ;;  %v2780_v63 = vpop.f32.mrb[50].mxu1 }
 0x3b9   :  { %v4637_v20 = vadd.f32 %v2780_v63, %v2730_v56  ;;  %v2306_v58 = vpop.f32.mrb[51].mxu1  ;;  %v2370_v33 = vmul.f32 %v4633_v55, %v4633_v55  ;;  %v2345_v25 = vsel %vm44_vm0, %v4633_v55, 0.0 }
 0x3ba   :  { %v2341_v24 = vsel %vm44_vm0, %v4635_v34, 0.0  ;;  %v2368_v39 = vmul.f32 %v4635_v34, %v4635_v34  ;;  %v2307_v53 = vadd.f32 %v2724_v7, %v2306_v58 }
 0x3bb   :  { %v2342_v43 = vadd.f32 %v2341_v24, %v2340_v42  ;;  %v2371_v31 = vmul.f32 %v4637_v20, %v4637_v20  ;;  %v2399_v50 = vsel %vm44_vm0, %v2370_v33, 0.0  ;;  %v2347_v60 = vsel %vm44_vm0, %v4637_v20, 0.0 }
 0x3bc   :  { %v2395_v13 = vsel %vm44_vm0, %v2368_v39, 0.0  ;;  %v2343_v51 = vsel %vm44_vm0, %v2307_v53, 0.0  ;;  %v2369_v49 = vmul.f32 %v2307_v53, %v2307_v53 }
 0x3bd   :  { %v2396_v2 = vadd.f32 %v2395_v13, %v2394_v12  ;;  %v2344_v26 = vadd.f32 %v2343_v51, %v2342_v43  ;;  %v2401_v41 = vsel %vm44_vm0, %v2371_v31, 0.0 }
 0x3be   :  { %v2397_v61 = vsel %vm44_vm0, %v2369_v49, 0.0 }
 0x3bf   :  { %v2346_v19 = vadd.f32 %v2345_v25, %v2344_v26  ;;  %v2398_v52 = vadd.f32 %v2397_v61, %v2396_v2 }
 0x3c1   :  { %v2348_v16 = vadd.f32 %v2347_v60, %v2346_v19  ;;  %v2400_v15 = vadd.f32 %v2399_v50, %v2398_v52 }
 0x3c3   :  { %v2349_v29 = vrot.slane %v2348_v16, 4  ;;  %v2402_v36 = vadd.f32 %v2401_v41, %v2400_v15 }
 0x3c5   :  { %v2350_v42 = vadd.f32 %v2349_v29, %v2348_v16  ;;  %v2403_v22 = vrot.slane %v2402_v36, 4 }
 0x3c7   :  { %v2351_v12 = vrot.slane %v2350_v42, 2  ;;  %v2404_v35 = vadd.f32 %v2403_v22, %v2402_v36 }
 0x3c9   :  { %v2352_v9 = vadd.f32 %v2351_v12, %v2350_v42  ;;  %v2405_v48 = vrot.slane %v2404_v35, 2 }
 0x3cb   :  { %v2353_v10 = vrot.slane %v2352_v9, 1  ;;  %v2406_v47 = vadd.f32 %v2405_v48, %v2404_v35 }
 0x3cd   :  { %v2354_v7 = vadd.f32 %v2353_v10, %v2352_v9  ;;  %v2407_v28 = vrot.slane %v2406_v47, 1 }
 0x3cf   :  { %v2355_v18 = vmul.f32 0.0078125, %v2354_v7  ;;  %v2408_v46 = vadd.f32 %v2407_v28, %v2406_v47 }
 0x3d1   :  { %v2409_v54 = vmul.f32 0.0078125, %v2408_v46  ;;  %v2410_v37 = vmul.f32 %v2355_v18, %v2355_v18  ;;  %v2425_v56 = vsub.f32 %v2307_v53, %v2355_v18  ;;  %v2417_v59 = vsub.f32 %v4570_v38, %v2355_v18  ;;  %v2430_v38 = vld [vmem:[%s4728_s5] sm:$0x1]  ;;  %s3341_s5 = smov [#allocation3]  }
 0x3d2   :  { %v2418_v63 = vsub.f32 %v4586_v32, %v2355_v18  ;;  %v2419_v58 = vsub.f32 %v4593_v44, %v2355_v18  ;;  %v2420_v24 = vsub.f32 %v4602_v23, %v2355_v18  ;;  %v2421_v39 = vsub.f32 %v4609_v40, %v2355_v18 }
 0x3d3   :  { %v2411_v27 = vsub.f32 %v2409_v54, %v2410_v37  ;;  %v2422_v43 = vsub.f32 %v4618_v21, %v2355_v18  ;;  %v2423_v33 = vsub.f32 %v4625_v45, %v2355_v18  ;;  %v2424_v51 = vsub.f32 %v4635_v34, %v2355_v18 }
 0x3d4   :  { %v2426_v53 = vsub.f32 %v4633_v55, %v2355_v18  ;;  %v2427_v49 = vsub.f32 %v4637_v20, %v2355_v18  ;;  %v4751_v23 = vsub.s32 0, %v4098_v62  ;;  %v2412_v21 = vsub.f32 %v4543_v30, %v2355_v18  ;;  %v2592_v55 = vld [vmem:[%s4729_s6] ss:$0 sm:$0xff]  ;;  %s2528_s6 = sshll.u32 %s3341_s5, 4  ;;  %s2529_s6 = int_to_ptr.vmem [resolvable:$true] %s2528_s6 }
 0x3d5   :  { %v2428_v13 = vadd.f32 1e-05, %v2411_v27  ;;  %v2413_v45 = vsub.f32 %v4545_v57, %v2355_v18  ;;  %v2414_v34 = vsub.f32 %v4547_v11, %v2355_v18  ;;  %v2415_v20 = vsub.f32 %v4549_v8, %v2355_v18  ;;  %s3313_s21 = scalar_lea.vmem %s2529_s6, 2048  ;;  %p3318_p1 = scmp.lt.s32.totalorder %s2529_s6, %s2529_s6 }
 0x3d6   :  { %v2416_v2 = vsub.f32 %v4564_v17, %v2355_v18  ;;  %p3314_p0 = scmp.ne.s32.totalorder %s2529_s6, %s3313_s21  ;;  %p3319_p2 = scmp.lt.s32.totalorder %s3313_s21, %s3313_s21 }
 0x3d7   :  { %3310 = vrsqrt.f32 %v2428_v13 }
 0x3d8   :  { %p3320_p3 = por %p3319_p2, %p3318_p1 }
 0x3da   :  { %p3321_p4 = pnand %p3320_p3, %p3314_p0 }
 0x3e1   :  { %v3311_v32 = vpop.eup %3310 }
 0x3e2   :  { %v2431_v44 = vmul.f32 %v3311_v32, %v2430_v38  ;;  %v4756_v32 = vld [vmem:[#allocation10_spill] sm:$0xff] }
 0x3e4   :  { %v2435_v40 = vrot.slane %v2431_v44, %v4751_v23  ;;  %v4757_v44 = vld [vmem:[#allocation11_spill] sm:$0xff]  ;;  %v4758_v23 = vld [vmem:[#allocation12_spill] sm:$0xff] }
 0x3e6   :  { %v2449_v26 = vmul.f32 %v2435_v40, %v2425_v56  ;;  %v2436_v25 = vmul.f32 %v2435_v40, %v2412_v21  ;;  %v2437_v31 = vmul.f32 %v2435_v40, %v2413_v45  ;;  %v2438_v61 = vmul.f32 %v2435_v40, %v2414_v34  ;;  %v4760_v21 = vld [vmem:[#allocation14_spill] sm:$0xff] }
 0x3e7   :  { %v2439_v62 = vmul.f32 %v2435_v40, %v2415_v20  ;;  %v2440_v19 = vmul.f32 %v2435_v40, %v2416_v2  ;;  %v2441_v52 = vmul.f32 %v2435_v40, %v2417_v59  ;;  %v2442_v30 = vmul.f32 %v2435_v40, %v2418_v63 }
 0x3e8   :  { %v2472_v50 = vadd.f32 %v2592_v55, %v2449_v26  ;;  %v2443_v57 = vmul.f32 %v2435_v40, %v2419_v58  ;;  %v2444_v60 = vmul.f32 %v2435_v40, %v2420_v24  ;;  %v2445_v11 = vmul.f32 %v2435_v40, %v2421_v39  ;;  %v4752_v39 = vld [vmem:[#allocation6_spill] sm:$0xff] }
 0x3e9   :  { %v2446_v16 = vmul.f32 %v2435_v40, %v2422_v43  ;;  %v2447_v15 = vmul.f32 %v2435_v40, %v2423_v33  ;;  %v2448_v41 = vmul.f32 %v2435_v40, %v2424_v51  ;;  %v2450_v29 = vmul.f32 %v2435_v40, %v2426_v53  ;;  %v4753_v33 = vld [vmem:[#allocation7_spill] sm:$0xff]  ;;  %v4754_v51 = vld [vmem:[#allocation8_spill] sm:$0xff] }
 0x3ea   :  { %v2488_v8 = vadd.f32 %v2472_v50, %v3510_v14  ;;  %v2451_v36 = vmul.f32 %v2435_v40, %v2427_v49  ;;  %v2459_v17 = vadd.f32 %v2592_v55, %v2436_v25  ;;  %v2460_v42 = vadd.f32 %v2592_v55, %v2437_v31  ;;  %v4755_v49 = vld [vmem:[#allocation9_spill] sm:$0xff] }
 0x3eb   :  { %v2461_v22 = vadd.f32 %v2592_v55, %v2438_v61  ;;  %v2462_v12 = vadd.f32 %v2592_v55, %v2439_v62  ;;  %v2463_v35 = vadd.f32 %v2592_v55, %v2440_v19  ;;  %v2464_v9 = vadd.f32 %v2592_v55, %v2441_v52  ;;  %v4759_v40 = vld [vmem:[#allocation13_spill] sm:$0xff] }
 0x3ec   :  { %v2504_v48 = vmax.f32 %v2488_v8, 0.0  ;;  %v2465_v10 = vadd.f32 %v2592_v55, %v2442_v30  ;;  %v2466_v47 = vadd.f32 %v2592_v55, %v2443_v57  ;;  %v2467_v7 = vadd.f32 %v2592_v55, %v2444_v60 }
 0x3ed   :  { %v2468_v28 = vadd.f32 %v2592_v55, %v2445_v11  ;;  %v2469_v18 = vadd.f32 %v2592_v55, %v2446_v16  ;;  %v2470_v46 = vadd.f32 %v2592_v55, %v2447_v15  ;;  %v2471_v54 = vadd.f32 %v2592_v55, %v2448_v41 }
 0x3ee   :  { %2520 = vst.msk [vmem:[#allocation3 + $0x68] sm:$0xff] %vm44_vm0, %v2504_v48  ;;  %v2473_v37 = vadd.f32 %v2592_v55, %v2450_v29  ;;  %v2474_v56 = vadd.f32 %v2592_v55, %v2451_v36  ;;  %v2475_v14 = vadd.f32 %v2459_v17, %v3437_v3  ;;  %v2476_v27 = vadd.f32 %v2460_v42, %v3387_v0 }
 0x3ef   :  { %v2477_v59 = vadd.f32 %v2461_v22, %v3392_v1  ;;  %v2478_v63 = vadd.f32 %v2462_v12, %v3442_v4  ;;  %v2479_v58 = vadd.f32 %v2463_v35, %v3447_v5  ;;  %v2480_v24 = vadd.f32 %v2464_v9, %v3458_v6 }
 0x3f0   :  { %v2481_v43 = vadd.f32 %v2465_v10, %v4752_v39  ;;  %v2482_v13 = vadd.f32 %v2466_v47, %v4753_v33  ;;  %v2483_v53 = vadd.f32 %v2467_v7, %v4754_v51  ;;  %v2484_v38 = vadd.f32 %v2468_v28, %v4755_v49 }
 0x3f1   :  { %v2485_v3 = vadd.f32 %v2469_v18, %v4756_v32  ;;  %v2486_v0 = vadd.f32 %v2470_v46, %v4757_v44  ;;  %v2487_v1 = vadd.f32 %v2471_v54, %v4758_v23  ;;  %v2489_v4 = vadd.f32 %v2473_v37, %v4759_v40 }
 0x3f2   :  { %v2490_v5 = vadd.f32 %v2474_v56, %v4760_v21  ;;  %v2491_v45 = vmax.f32 %v2475_v14, 0.0  ;;  %v2492_v6 = vmax.f32 %v2476_v27, 0.0  ;;  %v2493_v34 = vmax.f32 %v2477_v59, 0.0 }
 0x3f3   :  { %v2494_v55 = vmax.f32 %v2478_v63, 0.0  ;;  %v2495_v20 = vmax.f32 %v2479_v58, 0.0  ;;  %v2496_v2 = vmax.f32 %v2480_v24, 0.0  ;;  %v2497_v26 = vmax.f32 %v2481_v43, 0.0 }
 0x3f4   :  { %v2498_v25 = vmax.f32 %v2482_v13, 0.0  ;;  %v2499_v31 = vmax.f32 %v2483_v53, 0.0  ;;  %v2500_v61 = vmax.f32 %v2484_v38, 0.0  ;;  %v2501_v62 = vmax.f32 %v2485_v3, 0.0  ;;  %2507 = vst.msk [vmem:[#allocation3] sm:$0xff] %vm44_vm0, %v2491_v45  ;;  %2508 = vst.msk [vmem:[#allocation3 + $0x8] sm:$0xff] %vm44_vm0, %v2492_v6 }
 0x3f5   :  { %2509 = vst.msk [vmem:[#allocation3 + $0x10] sm:$0xff] %vm44_vm0, %v2493_v34  ;;  %v2502_v19 = vmax.f32 %v2486_v0, 0.0  ;;  %v2503_v52 = vmax.f32 %v2487_v1, 0.0  ;;  %v2505_v30 = vmax.f32 %v2489_v4, 0.0  ;;  %v2506_v50 = vmax.f32 %v2490_v5, 0.0  ;;  %2510 = vst.msk [vmem:[#allocation3 + $0x18] sm:$0xff] %vm44_vm0, %v2494_v55 }
 0x3f6   :  { %2511 = vst.msk [vmem:[#allocation3 + $0x20] sm:$0xff] %vm44_vm0, %v2495_v20  ;;  %2512 = vst.msk [vmem:[#allocation3 + $0x28] sm:$0xff] %vm44_vm0, %v2496_v2 }
 0x3f7   :  { %2513 = vst.msk [vmem:[#allocation3 + $0x30] sm:$0xff] %vm44_vm0, %v2497_v26  ;;  %2514 = vst.msk [vmem:[#allocation3 + $0x38] sm:$0xff] %vm44_vm0, %v2498_v25 }
 0x3f8   :  { %2515 = vst.msk [vmem:[#allocation3 + $0x40] sm:$0xff] %vm44_vm0, %v2499_v31  ;;  %2516 = vst.msk [vmem:[#allocation3 + $0x48] sm:$0xff] %vm44_vm0, %v2500_v61 }
 0x3f9   :  { %2517 = vst.msk [vmem:[#allocation3 + $0x50] sm:$0xff] %vm44_vm0, %v2501_v62  ;;  %2518 = vst.msk [vmem:[#allocation3 + $0x58] sm:$0xff] %vm44_vm0, %v2502_v19 }
 0x3fa   :  { %2519 = vst.msk [vmem:[#allocation3 + $0x60] sm:$0xff] %vm44_vm0, %v2503_v52  ;;  %2521 = vst.msk [vmem:[#allocation3 + $0x70] sm:$0xff] %vm44_vm0, %v2505_v30 }
 0x3fb   :  { %2522 = vst.msk [vmem:[#allocation3 + $0x78] sm:$0xff] %vm44_vm0, %v2506_v50 }
 0x3fc   :  { %3324 = shalt.err (!%p3321_p4)
}
 0x3fd   :  { %s3325_s24 = scalar_lea.hbm %s4730_s7, 2048 }
 0x3fe   :  { %p3326_p5 = scmp.ne.s32.totalorder %s4730_s7, %s3325_s24  ;;  %p3329_p6 = scmp.lt.u32.totalorder %s3325_s24, %s4730_s7 }
 0x400   :  { %p3331_p7 = pnand %p3329_p6, %p3326_p5 }
 0x402   :  { %3334 = shalt.err (!%p3331_p7)
}
 0x403   :  { %s3342_s28 = smov 128   ;;  %s3343_s29 = smov 8  }
 0x404   :  { %2534 = dma.vmem_to_hbm [thread:$0]  %s2529_s6, 2048, %s4730_s7, [#allocation4], %s3342_s28, %s3342_s28, %s3343_s29  }
 0x405   :  { %3335 = dma.done.wait [#allocation4], 2048  }
 0x406   :  { %3336 = vsyncadd [#allocation4], 4294965248 }
 0x407   :  { %2538 = vsyncpa [#allocation4], 1 }

</bundles_post_ra>
